<compile_context>
chip_gen: v6e
topology: v6e:2x2x1
jax: 0.10.0
libtpu: 0.0.40
codegen_flags: <defaults>
</compile_context>

<pallas_src>
import math
import functools

import jax
import jax.numpy as jnp
from jax.experimental import pallas as pl
from jax.experimental.pallas import tpu as pltpu

EPS = 1e-5  # PyTorch nn.LayerNorm default eps


def _ln(x, g, b):
    """LayerNorm over the last axis (biased variance, PyTorch semantics)."""
    mu = jnp.mean(x, axis=-1, keepdims=True)
    var = jnp.mean(jnp.square(x - mu), axis=-1, keepdims=True)
    return (x - mu) * jax.lax.rsqrt(var + EPS) * g + b


def _mm(a, b):
    """MXU matmul: bf16 operands, f32 accumulation."""
    return jnp.dot(a.astype(jnp.bfloat16), b.astype(jnp.bfloat16),
                   preferred_element_type=jnp.float32)


def rpe_mha_kernel(q_ref, k_ref, v_ref, rpe_ref,
                   wq_ref, wk_ref, wv_ref, wrk_ref, wrv_ref,
                   wo_ref, w1_ref, w2_ref, vdin_ref, vdm_ref,
                   o_ref, *, n_head):
    f32 = jnp.float32
    Bt, L_q, d_in = q_ref.shape
    L_k = k_ref.shape[1]
    dm = wq_ref.shape[1]
    H = n_head
    D = dm // H
    M_q, M_k, M_r = Bt * L_q, Bt * L_k, Bt * L_q * L_k
    d_pad = o_ref.shape[-1]

    # ---- packed small parameters (row slices are sublane slices: cheap) -----
    vdin = vdin_ref[...]
    g, beta = vdin[0:1, :], vdin[1:2, :]
    bo, b1, b2 = vdin[2:3, :], vdin[3:4, :], vdin[4:5, :]
    vdm = vdm_ref[...]
    bq, bk, bv, brv = vdm[0:1, :], vdm[1:2, :], vdm[2:3, :], vdm[3:4, :]

    # ---- pre-LayerNorm (f32), batched over all rows of the batch tile -------
    q_n = _ln(q_ref[...].reshape(M_q, d_in).astype(f32), g, beta)
    k_n = _ln(k_ref[...].reshape(M_k, d_in).astype(f32), g, beta)
    v_n = _ln(v_ref[...].reshape(M_k, d_in).astype(f32), g, beta)
    rpe_n = _ln(rpe_ref[...].reshape(M_r, d_in).astype(f32), g, beta)

    # ---- projections (bf16 MXU operands; 1/sqrt(D) already folded into wq/bq)
    q_p = _mm(q_n, wq_ref[...]) + bq            # (M_q, dm)
    k_p = _mm(k_n, wk_ref[...]) + bk            # (M_k, dm)
    v_p = _mm(v_n, wv_ref[...]) + bv            # (M_k, dm)
    rpe_k = _mm(rpe_n, wrk_ref[...])            # (M_r, dm), W_rpe_k has no bias
    rpe_v = _mm(rpe_n, wrv_ref[...]) + brv      # (M_r, dm)

    # ---- block-diagonal head-selection matrices (from 2-D iota) -------------
    d_row = jax.lax.broadcasted_iota(jnp.int32, (dm, H), 0)
    h_col = jax.lax.broadcasted_iota(jnp.int32, (dm, H), 1)
    sel = jnp.logical_and(d_row >= h_col * D, d_row < (h_col + 1) * D)
    s_f = jnp.where(sel, 1.0, 0.0).astype(f32)                    # (dm, H)
    s_bf = s_f.astype(jnp.bfloat16)
    h_row = jax.lax.broadcasted_iota(jnp.int32, (H, dm), 0)
    d_col = jax.lax.broadcasted_iota(jnp.int32, (H, dm), 1)
    sel_t = jnp.logical_and(d_col >= h_row * D, d_col < (h_row + 1) * D)
    st_bf = jnp.where(sel_t, 1.0, 0.0).astype(jnp.bfloat16)       # (H, dm)

    # ---- attention core: whole batch tile, all heads at once ----------------
    rpe_k4 = rpe_k.reshape(Bt, L_q, L_k, dm)
    rpe_v4 = rpe_v.reshape(Bt, L_q, L_k, dm)
    kf = rpe_k4 + k_p.reshape(Bt, 1, L_k, dm)                 # k + rpe_k
    vf = rpe_v4 + v_p.reshape(Bt, 1, L_k, dm)                 # v + rpe_v
    prod = kf * q_p.reshape(Bt, L_q, 1, dm)                   # q*(k+rpe_k)

    # per-head logits via one block-diagonal head-reduce matmul (MXU)
    logits = _mm(prod.reshape(M_r, dm), s_bf)                 # (M_r, H)
    logits = logits.reshape(Bt, L_q * L_k, H)

    # softmax over the *flattened* (L_q*L_k) axis per (batch, head) — as in ref
    m = jnp.max(logits, axis=1, keepdims=True)                # (Bt, 1, H)
    p = jnp.exp(logits - m)
    s = jnp.sum(p, axis=1, keepdims=True)                     # (Bt, 1, H)

    # head-expand the (unnormalized) probs back to lane layout and contract
    pexp = _mm(p.reshape(M_r, H), st_bf)                      # (M_r, dm)
    ov = jnp.sum(pexp.reshape(Bt, L_q, L_k, dm) * vf, axis=2)  # (Bt, L_q, dm)

    # fold 1/softmax-sum in at the end (per head -> per lane)
    inv_head = pl.reciprocal(s, approx=True)                  # (Bt, 1, H)
    inv_lane = jnp.sum(inv_head * s_f[None, :, :], axis=-1)   # (Bt, dm)
    qv = (ov * inv_lane.reshape(Bt, 1, dm)).reshape(M_q, dm)

    # ---- output projection + residual + MLP ---------------------------------
    attn_o = _mm(qv, wo_ref[...]) + bo
    qv1 = q_n + _ln(attn_o, g, beta)
    hidden = jnp.maximum(_mm(_ln(qv1, g, beta), w1_ref[...]) + b1, 0.0)
    mlp = _mm(hidden, w2_ref[...]) + b2
    y = qv1 + _ln(mlp, g, beta)                               # (M_q, d_in)

    # lane-dense store: pad to a multiple of 128 lanes (sliced off in wrapper)
    if d_pad > d_in:
        y = jnp.concatenate([y, jnp.zeros((M_q, d_pad - d_in), f32)], axis=-1)
    o_ref[...] = y.reshape(Bt, L_q, d_pad)


def pack_params(params, n_head):
    """One-time packing (hoisted out of the per-call path): fold 1/sqrt(d_head)
    into W_q / b_q, cast weights to bf16, stack small per-feature vectors."""
    dm = params["wq"].shape[1]
    assert dm % n_head == 0
    inv_scale = 1.0 / math.sqrt(dm // n_head)
    bf16 = jnp.bfloat16
    return {
        "wq": (params["wq"] * inv_scale).astype(bf16),
        "wk": params["wk"].astype(bf16),
        "wv": params["wv"].astype(bf16),
        "wrk": params["wrk"].astype(bf16),
        "wrv": params["wrv"].astype(bf16),
        "wo": params["wo"].astype(bf16),
        "w1": params["w1"].astype(bf16),
        "w2": params["w2"].astype(bf16),
        "vec_din": jnp.concatenate(
            [params["ln_g"], params["ln_b"], params["bo"], params["b1"],
             params["b2"]], axis=0).astype(jnp.float32),
        "vec_dm": jnp.concatenate(
            [params["bq"] * inv_scale, params["bk"], params["bv"],
             params["brv"]], axis=0).astype(jnp.float32),
    }


def rpe_mha_layer(q, k, v, rpe, packed, n_head, *, batch_tile=None):
    B, L_q, d_in = q.shape
    L_k = k.shape[1]
    # Default: >= 2 "parallel" grid steps (v7x megacore + pipelining).  Raise
    # batch_tile on v5e/v6e so the projection-matmul M grows toward 128/256.
    Bt = batch_tile if batch_tile is not None else max(1, B // 2)
    assert B % Bt == 0
    d_pad = ((d_in + 127) // 128) * 128

    # rpe is the dominant HBM stream -> move it in bf16.
    rpe_in = rpe if rpe.dtype == jnp.bfloat16 else rpe.astype(jnp.bfloat16)

    kernel = functools.partial(rpe_mha_kernel, n_head=n_head)
    batch3 = lambda i: (i, 0, 0)
    batch4 = lambda i: (i, 0, 0, 0)
    full2 = lambda i: (0, 0)
    weights = [packed[name] for name in
               ("wq", "wk", "wv", "wrk", "wrv", "wo", "w1", "w2")]

    out = pl.pallas_call(
        kernel,
        out_shape=jax.ShapeDtypeStruct((B, L_q, d_pad), jnp.float32),
        grid=(B // Bt,),
        in_specs=[
            pl.BlockSpec((Bt, L_q, d_in), batch3),
            pl.BlockSpec((Bt, L_k, d_in), batch3),
            pl.BlockSpec((Bt, L_k, d_in), batch3),
            pl.BlockSpec((Bt, L_q, L_k, d_in), batch4),
        ] + [pl.BlockSpec(w.shape, full2) for w in weights] + [
            pl.BlockSpec(packed["vec_din"].shape, full2),
            pl.BlockSpec(packed["vec_dm"].shape, full2),
        ],
        out_specs=pl.BlockSpec((Bt, L_q, d_pad), batch3),
        compiler_params=pltpu.CompilerParams(
            dimension_semantics=("parallel",),
            vmem_limit_bytes=64 * 1024 * 1024),
    )(q, k, v, rpe_in, *weights, packed["vec_din"], packed["vec_dm"])
    return out[..., :d_in]


# ---------------------- pure-JAX reference (mirrors PyTorch) -----------------
def _ref_ln(x, g, b):
    mu = x.mean(-1, keepdims=True)
    var = ((x - mu) ** 2).mean(-1, keepdims=True)
    return (x - mu) / jnp.sqrt(var + EPS) * g + b


def reference(q, k, v, rpe, p, n_head):
    B, L_q, d_in = q.shape
    L_k = k.shape[1]
    d_model = p["wq"].shape[1]
    D, H = d_model // n_head, n_head
    g, b_ = p["ln_g"][0], p["ln_b"][0]
    qn, kn, vn, rn = (_ref_ln(t, g, b_) for t in (q, k, v, rpe))
    q1 = (qn @ p["wq"] + p["bq"][0]).reshape(B, L_q, H, D).transpose(0, 2, 1, 3)
    k1 = (kn @ p["wk"] + p["bk"][0]).reshape(B, L_k, H, D).transpose(0, 2, 1, 3)
    v1 = (vn @ p["wv"] + p["bv"][0]).reshape(B, L_k, H, D).transpose(0, 2, 1, 3)
    rk = (rn @ p["wrk"]).reshape(B, L_q, L_k, H, D).transpose(0, 3, 1, 2, 4)
    rv = (rn @ p["wrv"] + p["brv"][0]).reshape(B, L_q, L_k, H, D).transpose(0, 3, 1, 2, 4)
    kf = k1[:, :, None, :, :] + rk
    vf = v1[:, :, None, :, :] + rv
    logits = (q1[:, :, :, None, :] * kf).sum(-1) / math.sqrt(D)     # (B,H,Lq,Lk)
    attn = jax.nn.softmax(logits.reshape(B, H, L_q * L_k), axis=-1).reshape(B, H, L_q, L_k)
    qv = (attn[..., None] * vf).sum(-2).transpose(0, 2, 1, 3).reshape(B, L_q, H * D)
    qv = qn + _ref_ln(qv @ p["wo"] + p["bo"][0], g, b_)
    hid = jax.nn.relu(_ref_ln(qv, g, b_) @ p["w1"] + p["b1"][0])
    mlp = hid @ p["w2"] + p["b2"][0]
    return qv + _ref_ln(mlp, g, b_)


# ---------------------------- parameter init ---------------------------------
def init_params(key, d_input, d_model):
    ks = jax.random.split(key, 17)
    def rnd(k, shape, scale=0.1):
        return (scale * jax.random.normal(k, shape)).astype(jnp.float32)
    p = {}
    p["ln_g"] = (1.0 + rnd(ks[0], (1, d_input), 0.05))
    p["ln_b"] = rnd(ks[1], (1, d_input), 0.05)
    p["wq"] = rnd(ks[2], (d_input, d_model));  p["bq"] = rnd(ks[3], (1, d_model))
    p["wk"] = rnd(ks[4], (d_input, d_model));  p["bk"] = rnd(ks[5], (1, d_model))
    p["wv"] = rnd(ks[6], (d_input, d_model));  p["bv"] = rnd(ks[7], (1, d_model))
    p["wrk"] = rnd(ks[8], (d_input, d_model))  # W_rpe_k has no bias
    p["wrv"] = rnd(ks[9], (d_input, d_model)); p["brv"] = rnd(ks[10], (1, d_model))
    p["wo"] = rnd(ks[11], (d_model, d_input)); p["bo"] = rnd(ks[12], (1, d_input))
    p["w1"] = rnd(ks[13], (d_input, d_input)); p["b1"] = rnd(ks[14], (1, d_input))
    p["w2"] = rnd(ks[15], (d_input, d_input)); p["b2"] = rnd(ks[16], (1, d_input))
    return p


if __name__ == "__main__":
    B, L_q, L_k = 2, 8, 8
    d_input, d_model, n_head = 32, 32, 4

    key = jax.random.PRNGKey(0)
    kq, kk, kv, kr, kp = jax.random.split(key, 5)
    q = jax.random.normal(kq, (B, L_q, d_input), dtype=jnp.float32)
    k = jax.random.normal(kk, (B, L_k, d_input), dtype=jnp.float32)
    v = jax.random.normal(kv, (B, L_k, d_input), dtype=jnp.float32)
    rpe = jax.random.normal(kr, (B, L_q, L_k, d_input), dtype=jnp.float32)
    params = init_params(kp, d_input, d_model)
    packed = pack_params(params, n_head)   # one-time packing (hoisted)

    # The kernel deliberately moves rpe in bf16; quantize it once so the kernel
    # and the f32 reference consume the same input representation.
    rpe_q = rpe.astype(jnp.bfloat16).astype(jnp.float32)

    out = rpe_mha_layer(q, k, v, rpe_q, packed, n_head)
    out = jax.block_until_ready(out)

    ref = jax.block_until_ready(reference(q, k, v, rpe_q, params, n_head))
    assert out.shape == (B, L_q, d_input)
    assert jnp.all(jnp.isfinite(out))
    # Tolerance reflects deliberate bf16 MXU operands (per perf review) vs. a
    # pure-f32 reference; LN / softmax math is kept in f32 inside the kernel.
    assert jnp.allclose(out, ref, atol=5e-2, rtol=5e-2), \
        float(jnp.max(jnp.abs(out - ref)))

    print("KERNEL_OK")
</pallas_src>

<mosaic_0001>
module attributes {stable_mosaic.version = 11 : i64} {
  func.func @rpe_mha_kernel(%arg0: i32, %arg1: memref<1x8x32xf32, #tpu.memory_space<vmem>>, %arg2: memref<1x8x32xf32, #tpu.memory_space<vmem>>, %arg3: memref<1x8x32xf32, #tpu.memory_space<vmem>>, %arg4: memref<1x8x8x32xbf16, #tpu.memory_space<vmem>>, %arg5: memref<32x32xbf16, #tpu.memory_space<vmem>>, %arg6: memref<32x32xbf16, #tpu.memory_space<vmem>>, %arg7: memref<32x32xbf16, #tpu.memory_space<vmem>>, %arg8: memref<32x32xbf16, #tpu.memory_space<vmem>>, %arg9: memref<32x32xbf16, #tpu.memory_space<vmem>>, %arg10: memref<32x32xbf16, #tpu.memory_space<vmem>>, %arg11: memref<32x32xbf16, #tpu.memory_space<vmem>>, %arg12: memref<32x32xbf16, #tpu.memory_space<vmem>>, %arg13: memref<5x32xf32, #tpu.memory_space<vmem>>, %arg14: memref<4x32xf32, #tpu.memory_space<vmem>>, %arg15: memref<1x8x128xf32, #tpu.memory_space<vmem>>) attributes {dimension_semantics = [#tpu.dimension_semantics<parallel>], iteration_bounds = array<i64: 2>, scalar_prefetch = 0 : i64, scratch_operands = 0 : i64, tpu.core_type = #tpu.core_type<tc>, window_params = [{transform_indices = @transform_0, window_bounds = array<i64: 1, 8, 32>}, {transform_indices = @transform_1, window_bounds = array<i64: 1, 8, 32>}, {transform_indices = @transform_2, window_bounds = array<i64: 1, 8, 32>}, {transform_indices = @transform_3, window_bounds = array<i64: 1, 8, 8, 32>}, {pipeline_mode = #tpu.pipeline_mode<synchronous>, transform_indices = @transform_4, window_bounds = array<i64: 32, 32>}, {pipeline_mode = #tpu.pipeline_mode<synchronous>, transform_indices = @transform_5, window_bounds = array<i64: 32, 32>}, {pipeline_mode = #tpu.pipeline_mode<synchronous>, transform_indices = @transform_6, window_bounds = array<i64: 32, 32>}, {pipeline_mode = #tpu.pipeline_mode<synchronous>, transform_indices = @transform_7, window_bounds = array<i64: 32, 32>}, {pipeline_mode = #tpu.pipeline_mode<synchronous>, transform_indices = @transform_8, window_bounds = array<i64: 32, 32>}, {pipeline_mode = #tpu.pipeline_mode<synchronous>, transform_indices = @transform_9, window_bounds = array<i64: 32, 32>}, {pipeline_mode = #tpu.pipeline_mode<synchronous>, transform_indices = @transform_10, window_bounds = array<i64: 32, 32>}, {pipeline_mode = #tpu.pipeline_mode<synchronous>, transform_indices = @transform_11, window_bounds = array<i64: 32, 32>}, {pipeline_mode = #tpu.pipeline_mode<synchronous>, transform_indices = @transform_12, window_bounds = array<i64: 5, 32>}, {pipeline_mode = #tpu.pipeline_mode<synchronous>, transform_indices = @transform_13, window_bounds = array<i64: 4, 32>}, {transform_indices = @transform_14, window_bounds = array<i64: 1, 8, 128>}]} {
    %c0 = arith.constant 0 : index
    %c0_0 = arith.constant 0 : index
    %0 = vector.load %arg13[%c0, %c0_0] : memref<5x32xf32, #tpu.memory_space<vmem>>, vector<5x32xf32>
    %1 = vector.extract_strided_slice %0 {offsets = [0, 0], sizes = [1, 32], strides = [1, 1]} : vector<5x32xf32> to vector<1x32xf32>
    %2 = vector.extract_strided_slice %0 {offsets = [1, 0], sizes = [1, 32], strides = [1, 1]} : vector<5x32xf32> to vector<1x32xf32>
    %3 = vector.extract_strided_slice %0 {offsets = [2, 0], sizes = [1, 32], strides = [1, 1]} : vector<5x32xf32> to vector<1x32xf32>
    %4 = vector.extract_strided_slice %0 {offsets = [3, 0], sizes = [1, 32], strides = [1, 1]} : vector<5x32xf32> to vector<1x32xf32>
    %5 = vector.extract_strided_slice %0 {offsets = [4, 0], sizes = [1, 32], strides = [1, 1]} : vector<5x32xf32> to vector<1x32xf32>
    %c0_1 = arith.constant 0 : index
    %c0_2 = arith.constant 0 : index
    %6 = vector.load %arg14[%c0_1, %c0_2] : memref<4x32xf32, #tpu.memory_space<vmem>>, vector<4x32xf32>
    %7 = vector.extract_strided_slice %6 {offsets = [0, 0], sizes = [1, 32], strides = [1, 1]} : vector<4x32xf32> to vector<1x32xf32>
    %8 = vector.extract_strided_slice %6 {offsets = [1, 0], sizes = [1, 32], strides = [1, 1]} : vector<4x32xf32> to vector<1x32xf32>
    %9 = vector.extract_strided_slice %6 {offsets = [2, 0], sizes = [1, 32], strides = [1, 1]} : vector<4x32xf32> to vector<1x32xf32>
    %10 = vector.extract_strided_slice %6 {offsets = [3, 0], sizes = [1, 32], strides = [1, 1]} : vector<4x32xf32> to vector<1x32xf32>
    %c0_3 = arith.constant 0 : index
    %c0_4 = arith.constant 0 : index
    %c0_5 = arith.constant 0 : index
    %11 = vector.load %arg1[%c0_3, %c0_4, %c0_5] : memref<1x8x32xf32, #tpu.memory_space<vmem>>, vector<1x8x32xf32>
    %12 = vector.shape_cast %11 : vector<1x8x32xf32> to vector<8x32xf32>
    %cst = arith.constant dense<0.000000e+00> : vector<8xf32>
    %13 = vector.multi_reduction <add>, %12, %cst [1] : vector<8x32xf32> to vector<8xf32>
    %14 = vector.shape_cast %13 : vector<8xf32> to vector<8x1xf32>
    %cst_6 = arith.constant 3.200000e+01 : f32
    %15 = vector.broadcast %cst_6 : f32 to vector<8x1xf32>
    %16 = arith.divf %14, %15 : vector<8x1xf32>
    %17 = vector.broadcast %16 : vector<8x1xf32> to vector<8x32xf32>
    %18 = arith.subf %12, %17 : vector<8x32xf32>
    %19 = arith.mulf %18, %18 : vector<8x32xf32>
    %cst_7 = arith.constant dense<0.000000e+00> : vector<8xf32>
    %20 = vector.multi_reduction <add>, %19, %cst_7 [1] : vector<8x32xf32> to vector<8xf32>
    %21 = vector.shape_cast %20 : vector<8xf32> to vector<8x1xf32>
    %cst_8 = arith.constant 3.200000e+01 : f32
    %22 = vector.broadcast %cst_8 : f32 to vector<8x1xf32>
    %23 = arith.divf %21, %22 : vector<8x1xf32>
    %24 = vector.broadcast %16 : vector<8x1xf32> to vector<8x32xf32>
    %25 = arith.subf %12, %24 : vector<8x32xf32>
    %cst_9 = arith.constant 9.99999974E-6 : f32
    %26 = vector.broadcast %cst_9 : f32 to vector<8x1xf32>
    %27 = arith.addf %23, %26 : vector<8x1xf32>
    %28 = math.rsqrt %27 : vector<8x1xf32>
    %29 = vector.broadcast %28 : vector<8x1xf32> to vector<8x32xf32>
    %30 = arith.mulf %25, %29 : vector<8x32xf32>
    %31 = vector.broadcast %1 : vector<1x32xf32> to vector<8x32xf32>
    %32 = arith.mulf %30, %31 : vector<8x32xf32>
    %33 = vector.broadcast %2 : vector<1x32xf32> to vector<8x32xf32>
    %34 = arith.addf %32, %33 : vector<8x32xf32>
    %c0_10 = arith.constant 0 : index
    %c0_11 = arith.constant 0 : index
    %c0_12 = arith.constant 0 : index
    %35 = vector.load %arg2[%c0_10, %c0_11, %c0_12] : memref<1x8x32xf32, #tpu.memory_space<vmem>>, vector<1x8x32xf32>
    %36 = vector.shape_cast %35 : vector<1x8x32xf32> to vector<8x32xf32>
    %cst_13 = arith.constant dense<0.000000e+00> : vector<8xf32>
    %37 = vector.multi_reduction <add>, %36, %cst_13 [1] : vector<8x32xf32> to vector<8xf32>
    %38 = vector.shape_cast %37 : vector<8xf32> to vector<8x1xf32>
    %cst_14 = arith.constant 3.200000e+01 : f32
    %39 = vector.broadcast %cst_14 : f32 to vector<8x1xf32>
    %40 = arith.divf %38, %39 : vector<8x1xf32>
    %41 = vector.broadcast %40 : vector<8x1xf32> to vector<8x32xf32>
    %42 = arith.subf %36, %41 : vector<8x32xf32>
    %43 = arith.mulf %42, %42 : vector<8x32xf32>
    %cst_15 = arith.constant dense<0.000000e+00> : vector<8xf32>
    %44 = vector.multi_reduction <add>, %43, %cst_15 [1] : vector<8x32xf32> to vector<8xf32>
    %45 = vector.shape_cast %44 : vector<8xf32> to vector<8x1xf32>
    %cst_16 = arith.constant 3.200000e+01 : f32
    %46 = vector.broadcast %cst_16 : f32 to vector<8x1xf32>
    %47 = arith.divf %45, %46 : vector<8x1xf32>
    %48 = vector.broadcast %40 : vector<8x1xf32> to vector<8x32xf32>
    %49 = arith.subf %36, %48 : vector<8x32xf32>
    %cst_17 = arith.constant 9.99999974E-6 : f32
    %50 = vector.broadcast %cst_17 : f32 to vector<8x1xf32>
    %51 = arith.addf %47, %50 : vector<8x1xf32>
    %52 = math.rsqrt %51 : vector<8x1xf32>
    %53 = vector.broadcast %52 : vector<8x1xf32> to vector<8x32xf32>
    %54 = arith.mulf %49, %53 : vector<8x32xf32>
    %55 = vector.broadcast %1 : vector<1x32xf32> to vector<8x32xf32>
    %56 = arith.mulf %54, %55 : vector<8x32xf32>
    %57 = vector.broadcast %2 : vector<1x32xf32> to vector<8x32xf32>
    %58 = arith.addf %56, %57 : vector<8x32xf32>
    %c0_18 = arith.constant 0 : index
    %c0_19 = arith.constant 0 : index
    %c0_20 = arith.constant 0 : index
    %59 = vector.load %arg3[%c0_18, %c0_19, %c0_20] : memref<1x8x32xf32, #tpu.memory_space<vmem>>, vector<1x8x32xf32>
    %60 = vector.shape_cast %59 : vector<1x8x32xf32> to vector<8x32xf32>
    %cst_21 = arith.constant dense<0.000000e+00> : vector<8xf32>
    %61 = vector.multi_reduction <add>, %60, %cst_21 [1] : vector<8x32xf32> to vector<8xf32>
    %62 = vector.shape_cast %61 : vector<8xf32> to vector<8x1xf32>
    %cst_22 = arith.constant 3.200000e+01 : f32
    %63 = vector.broadcast %cst_22 : f32 to vector<8x1xf32>
    %64 = arith.divf %62, %63 : vector<8x1xf32>
    %65 = vector.broadcast %64 : vector<8x1xf32> to vector<8x32xf32>
    %66 = arith.subf %60, %65 : vector<8x32xf32>
    %67 = arith.mulf %66, %66 : vector<8x32xf32>
    %cst_23 = arith.constant dense<0.000000e+00> : vector<8xf32>
    %68 = vector.multi_reduction <add>, %67, %cst_23 [1] : vector<8x32xf32> to vector<8xf32>
    %69 = vector.shape_cast %68 : vector<8xf32> to vector<8x1xf32>
    %cst_24 = arith.constant 3.200000e+01 : f32
    %70 = vector.broadcast %cst_24 : f32 to vector<8x1xf32>
    %71 = arith.divf %69, %70 : vector<8x1xf32>
    %72 = vector.broadcast %64 : vector<8x1xf32> to vector<8x32xf32>
    %73 = arith.subf %60, %72 : vector<8x32xf32>
    %cst_25 = arith.constant 9.99999974E-6 : f32
    %74 = vector.broadcast %cst_25 : f32 to vector<8x1xf32>
    %75 = arith.addf %71, %74 : vector<8x1xf32>
    %76 = math.rsqrt %75 : vector<8x1xf32>
    %77 = vector.broadcast %76 : vector<8x1xf32> to vector<8x32xf32>
    %78 = arith.mulf %73, %77 : vector<8x32xf32>
    %79 = vector.broadcast %1 : vector<1x32xf32> to vector<8x32xf32>
    %80 = arith.mulf %78, %79 : vector<8x32xf32>
    %81 = vector.broadcast %2 : vector<1x32xf32> to vector<8x32xf32>
    %82 = arith.addf %80, %81 : vector<8x32xf32>
    %c0_26 = arith.constant 0 : index
    %c0_27 = arith.constant 0 : index
    %c0_28 = arith.constant 0 : index
    %c0_29 = arith.constant 0 : index
    %83 = vector.load %arg4[%c0_26, %c0_27, %c0_28, %c0_29] : memref<1x8x8x32xbf16, #tpu.memory_space<vmem>>, vector<1x8x8x32xbf16>
    %84 = vector.shape_cast %83 : vector<1x8x8x32xbf16> to vector<64x32xbf16>
    %85 = arith.extf %84 : vector<64x32xbf16> to vector<64x32xf32>
    %cst_30 = arith.constant dense<0.000000e+00> : vector<64xf32>
    %86 = vector.multi_reduction <add>, %85, %cst_30 [1] : vector<64x32xf32> to vector<64xf32>
    %87 = vector.shape_cast %86 : vector<64xf32> to vector<64x1xf32>
    %cst_31 = arith.constant 3.200000e+01 : f32
    %88 = vector.broadcast %cst_31 : f32 to vector<64x1xf32>
    %89 = arith.divf %87, %88 : vector<64x1xf32>
    %90 = vector.broadcast %89 : vector<64x1xf32> to vector<64x32xf32>
    %91 = arith.subf %85, %90 : vector<64x32xf32>
    %92 = arith.mulf %91, %91 : vector<64x32xf32>
    %cst_32 = arith.constant dense<0.000000e+00> : vector<64xf32>
    %93 = vector.multi_reduction <add>, %92, %cst_32 [1] : vector<64x32xf32> to vector<64xf32>
    %94 = vector.shape_cast %93 : vector<64xf32> to vector<64x1xf32>
    %cst_33 = arith.constant 3.200000e+01 : f32
    %95 = vector.broadcast %cst_33 : f32 to vector<64x1xf32>
    %96 = arith.divf %94, %95 : vector<64x1xf32>
    %97 = vector.broadcast %89 : vector<64x1xf32> to vector<64x32xf32>
    %98 = arith.subf %85, %97 : vector<64x32xf32>
    %cst_34 = arith.constant 9.99999974E-6 : f32
    %99 = vector.broadcast %cst_34 : f32 to vector<64x1xf32>
    %100 = arith.addf %96, %99 : vector<64x1xf32>
    %101 = math.rsqrt %100 : vector<64x1xf32>
    %102 = vector.broadcast %101 : vector<64x1xf32> to vector<64x32xf32>
    %103 = arith.mulf %98, %102 : vector<64x32xf32>
    %104 = vector.broadcast %1 : vector<1x32xf32> to vector<64x32xf32>
    %105 = arith.mulf %103, %104 : vector<64x32xf32>
    %106 = vector.broadcast %2 : vector<1x32xf32> to vector<64x32xf32>
    %107 = arith.addf %105, %106 : vector<64x32xf32>
    %c0_35 = arith.constant 0 : index
    %c0_36 = arith.constant 0 : index
    %108 = vector.load %arg5[%c0_35, %c0_36] : memref<32x32xbf16, #tpu.memory_space<vmem>>, vector<32x32xbf16>
    %109 = arith.truncf %34 : vector<8x32xf32> to vector<8x32xbf16>
    %cst_37 = arith.constant dense<0.000000e+00> : vector<8x32xf32>
    %110 = tpu.matmul %109, %108, %cst_37 {dimension_numbers = #tpu.dot_dimension_numbers<[1], [0], [0], [1], [0, 0, 1, 1], [], []>} : vector<8x32xbf16>, vector<32x32xbf16>, vector<8x32xf32> -> vector<8x32xf32>
    %111 = vector.broadcast %7 : vector<1x32xf32> to vector<8x32xf32>
    %112 = arith.addf %110, %111 : vector<8x32xf32>
    %c0_38 = arith.constant 0 : index
    %c0_39 = arith.constant 0 : index
    %113 = vector.load %arg6[%c0_38, %c0_39] : memref<32x32xbf16, #tpu.memory_space<vmem>>, vector<32x32xbf16>
    %114 = arith.truncf %58 : vector<8x32xf32> to vector<8x32xbf16>
    %cst_40 = arith.constant dense<0.000000e+00> : vector<8x32xf32>
    %115 = tpu.matmul %114, %113, %cst_40 {dimension_numbers = #tpu.dot_dimension_numbers<[1], [0], [0], [1], [0, 0, 1, 1], [], []>} : vector<8x32xbf16>, vector<32x32xbf16>, vector<8x32xf32> -> vector<8x32xf32>
    %116 = vector.broadcast %8 : vector<1x32xf32> to vector<8x32xf32>
    %117 = arith.addf %115, %116 : vector<8x32xf32>
    %c0_41 = arith.constant 0 : index
    %c0_42 = arith.constant 0 : index
    %118 = vector.load %arg7[%c0_41, %c0_42] : memref<32x32xbf16, #tpu.memory_space<vmem>>, vector<32x32xbf16>
    %119 = arith.truncf %82 : vector<8x32xf32> to vector<8x32xbf16>
    %cst_43 = arith.constant dense<0.000000e+00> : vector<8x32xf32>
    %120 = tpu.matmul %119, %118, %cst_43 {dimension_numbers = #tpu.dot_dimension_numbers<[1], [0], [0], [1], [0, 0, 1, 1], [], []>} : vector<8x32xbf16>, vector<32x32xbf16>, vector<8x32xf32> -> vector<8x32xf32>
    %121 = vector.broadcast %9 : vector<1x32xf32> to vector<8x32xf32>
    %122 = arith.addf %120, %121 : vector<8x32xf32>
    %c0_44 = arith.constant 0 : index
    %c0_45 = arith.constant 0 : index
    %123 = vector.load %arg8[%c0_44, %c0_45] : memref<32x32xbf16, #tpu.memory_space<vmem>>, vector<32x32xbf16>
    %124 = arith.truncf %107 : vector<64x32xf32> to vector<64x32xbf16>
    %cst_46 = arith.constant dense<0.000000e+00> : vector<64x32xf32>
    %125 = tpu.matmul %124, %123, %cst_46 {dimension_numbers = #tpu.dot_dimension_numbers<[1], [0], [0], [1], [0, 0, 1, 1], [], []>} : vector<64x32xbf16>, vector<32x32xbf16>, vector<64x32xf32> -> vector<64x32xf32>
    %c0_47 = arith.constant 0 : index
    %c0_48 = arith.constant 0 : index
    %126 = vector.load %arg9[%c0_47, %c0_48] : memref<32x32xbf16, #tpu.memory_space<vmem>>, vector<32x32xbf16>
    %127 = arith.truncf %107 : vector<64x32xf32> to vector<64x32xbf16>
    %cst_49 = arith.constant dense<0.000000e+00> : vector<64x32xf32>
    %128 = tpu.matmul %127, %126, %cst_49 {dimension_numbers = #tpu.dot_dimension_numbers<[1], [0], [0], [1], [0, 0, 1, 1], [], []>} : vector<64x32xbf16>, vector<32x32xbf16>, vector<64x32xf32> -> vector<64x32xf32>
    %129 = vector.broadcast %10 : vector<1x32xf32> to vector<64x32xf32>
    %130 = arith.addf %128, %129 : vector<64x32xf32>
    %131 = tpu.iota {dimensions = array<i32: 0>} : vector<32x4xi32>
    %132 = tpu.iota {dimensions = array<i32: 1>} : vector<32x4xi32>
    %c8_i32 = arith.constant 8 : i32
    %133 = vector.broadcast %c8_i32 : i32 to vector<32x4xi32>
    %134 = arith.muli %132, %133 : vector<32x4xi32>
    %135 = arith.cmpi sge, %131, %134 : vector<32x4xi32>
    %c1_i32 = arith.constant 1 : i32
    %136 = vector.broadcast %c1_i32 : i32 to vector<32x4xi32>
    %137 = arith.addi %132, %136 : vector<32x4xi32>
    %c8_i32_50 = arith.constant 8 : i32
    %138 = vector.broadcast %c8_i32_50 : i32 to vector<32x4xi32>
    %139 = arith.muli %137, %138 : vector<32x4xi32>
    %140 = arith.cmpi slt, %131, %139 : vector<32x4xi32>
    %141 = arith.andi %135, %140 : vector<32x4xi1>
    %cst_51 = arith.constant 1.000000e+00 : f32
    %cst_52 = arith.constant 0.000000e+00 : f32
    %142 = vector.broadcast %cst_51 : f32 to vector<32x4xf32>
    %143 = vector.broadcast %cst_52 : f32 to vector<32x4xf32>
    %144 = arith.select %141, %142, %143 : vector<32x4xi1>, vector<32x4xf32>
    %145 = arith.truncf %144 : vector<32x4xf32> to vector<32x4xbf16>
    %146 = tpu.iota {dimensions = array<i32: 0>} : vector<4x32xi32>
    %147 = tpu.iota {dimensions = array<i32: 1>} : vector<4x32xi32>
    %c8_i32_53 = arith.constant 8 : i32
    %148 = vector.broadcast %c8_i32_53 : i32 to vector<4x32xi32>
    %149 = arith.muli %146, %148 : vector<4x32xi32>
    %150 = arith.cmpi sge, %147, %149 : vector<4x32xi32>
    %c1_i32_54 = arith.constant 1 : i32
    %151 = vector.broadcast %c1_i32_54 : i32 to vector<4x32xi32>
    %152 = arith.addi %146, %151 : vector<4x32xi32>
    %c8_i32_55 = arith.constant 8 : i32
    %153 = vector.broadcast %c8_i32_55 : i32 to vector<4x32xi32>
    %154 = arith.muli %152, %153 : vector<4x32xi32>
    %155 = arith.cmpi slt, %147, %154 : vector<4x32xi32>
    %156 = arith.andi %150, %155 : vector<4x32xi1>
    %cst_56 = arith.constant 1.000000e+00 : f32
    %cst_57 = arith.constant 0.000000e+00 : f32
    %157 = vector.broadcast %cst_56 : f32 to vector<4x32xf32>
    %158 = vector.broadcast %cst_57 : f32 to vector<4x32xf32>
    %159 = arith.select %156, %157, %158 : vector<4x32xi1>, vector<4x32xf32>
    %160 = arith.truncf %159 : vector<4x32xf32> to vector<4x32xbf16>
    %161 = vector.shape_cast %125 : vector<64x32xf32> to vector<1x8x8x32xf32>
    %162 = vector.shape_cast %130 : vector<64x32xf32> to vector<1x8x8x32xf32>
    %163 = vector.shape_cast %117 : vector<8x32xf32> to vector<1x1x8x32xf32>
    %164 = vector.broadcast %163 : vector<1x1x8x32xf32> to vector<1x8x8x32xf32>
    %165 = arith.addf %161, %164 : vector<1x8x8x32xf32>
    %166 = vector.shape_cast %122 : vector<8x32xf32> to vector<1x1x8x32xf32>
    %167 = vector.broadcast %166 : vector<1x1x8x32xf32> to vector<1x8x8x32xf32>
    %168 = arith.addf %162, %167 : vector<1x8x8x32xf32>
    %169 = vector.shape_cast %112 : vector<8x32xf32> to vector<1x8x1x32xf32>
    %170 = vector.broadcast %169 : vector<1x8x1x32xf32> to vector<1x8x8x32xf32>
    %171 = arith.mulf %165, %170 : vector<1x8x8x32xf32>
    %172 = vector.shape_cast %171 : vector<1x8x8x32xf32> to vector<64x32xf32>
    %173 = arith.truncf %172 : vector<64x32xf32> to vector<64x32xbf16>
    %cst_58 = arith.constant dense<0.000000e+00> : vector<64x4xf32>
    %174 = tpu.matmul %173, %145, %cst_58 {dimension_numbers = #tpu.dot_dimension_numbers<[1], [0], [0], [1], [0, 0, 1, 1], [], []>} : vector<64x32xbf16>, vector<32x4xbf16>, vector<64x4xf32> -> vector<64x4xf32>
    %175 = vector.shape_cast %174 : vector<64x4xf32> to vector<1x64x4xf32>
    %cst_59 = arith.constant dense<0xFF800000> : vector<1x4xf32>
    %176 = vector.multi_reduction <maximumf>, %175, %cst_59 [1] : vector<1x64x4xf32> to vector<1x4xf32>
    %177 = vector.shape_cast %176 : vector<1x4xf32> to vector<1x1x4xf32>
    %178 = vector.broadcast %177 : vector<1x1x4xf32> to vector<1x64x4xf32>
    %179 = arith.subf %175, %178 : vector<1x64x4xf32>
    %180 = math.exp %179 : vector<1x64x4xf32>
    %cst_60 = arith.constant dense<0.000000e+00> : vector<1x4xf32>
    %181 = vector.multi_reduction <add>, %180, %cst_60 [1] : vector<1x64x4xf32> to vector<1x4xf32>
    %182 = vector.shape_cast %181 : vector<1x4xf32> to vector<1x1x4xf32>
    %183 = vector.shape_cast %180 : vector<1x64x4xf32> to vector<64x4xf32>
    %184 = arith.truncf %183 : vector<64x4xf32> to vector<64x4xbf16>
    %cst_61 = arith.constant dense<0.000000e+00> : vector<64x32xf32>
    %185 = tpu.matmul %184, %160, %cst_61 {dimension_numbers = #tpu.dot_dimension_numbers<[1], [0], [0], [1], [0, 0, 1, 1], [], []>} : vector<64x4xbf16>, vector<4x32xbf16>, vector<64x32xf32> -> vector<64x32xf32>
    %186 = vector.shape_cast %185 : vector<64x32xf32> to vector<1x8x8x32xf32>
    %187 = arith.mulf %186, %168 : vector<1x8x8x32xf32>
    %cst_62 = arith.constant dense<0.000000e+00> : vector<1x8x32xf32>
    %188 = vector.multi_reduction <add>, %187, %cst_62 [2] : vector<1x8x8x32xf32> to vector<1x8x32xf32>
    %189 = tpu.reciprocal %182 {approx = true} : vector<1x1x4xf32> -> vector<1x1x4xf32>
    %190 = vector.shape_cast %144 : vector<32x4xf32> to vector<1x32x4xf32>
    %191 = vector.broadcast %189 : vector<1x1x4xf32> to vector<1x32x4xf32>
    %192 = arith.mulf %191, %190 : vector<1x32x4xf32>
    %cst_63 = arith.constant dense<0.000000e+00> : vector<1x32xf32>
    %193 = vector.multi_reduction <add>, %192, %cst_63 [2] : vector<1x32x4xf32> to vector<1x32xf32>
    %194 = vector.shape_cast %193 : vector<1x32xf32> to vector<1x1x32xf32>
    %195 = vector.broadcast %194 : vector<1x1x32xf32> to vector<1x8x32xf32>
    %196 = arith.mulf %188, %195 : vector<1x8x32xf32>
    %197 = vector.shape_cast %196 : vector<1x8x32xf32> to vector<8x32xf32>
    %c0_64 = arith.constant 0 : index
    %c0_65 = arith.constant 0 : index
    %198 = vector.load %arg10[%c0_64, %c0_65] : memref<32x32xbf16, #tpu.memory_space<vmem>>, vector<32x32xbf16>
    %199 = arith.truncf %197 : vector<8x32xf32> to vector<8x32xbf16>
    %cst_66 = arith.constant dense<0.000000e+00> : vector<8x32xf32>
    %200 = tpu.matmul %199, %198, %cst_66 {dimension_numbers = #tpu.dot_dimension_numbers<[1], [0], [0], [1], [0, 0, 1, 1], [], []>} : vector<8x32xbf16>, vector<32x32xbf16>, vector<8x32xf32> -> vector<8x32xf32>
    %201 = vector.broadcast %3 : vector<1x32xf32> to vector<8x32xf32>
    %202 = arith.addf %200, %201 : vector<8x32xf32>
    %cst_67 = arith.constant dense<0.000000e+00> : vector<8xf32>
    %203 = vector.multi_reduction <add>, %202, %cst_67 [1] : vector<8x32xf32> to vector<8xf32>
    %204 = vector.shape_cast %203 : vector<8xf32> to vector<8x1xf32>
    %cst_68 = arith.constant 3.200000e+01 : f32
    %205 = vector.broadcast %cst_68 : f32 to vector<8x1xf32>
    %206 = arith.divf %204, %205 : vector<8x1xf32>
    %207 = vector.broadcast %206 : vector<8x1xf32> to vector<8x32xf32>
    %208 = arith.subf %202, %207 : vector<8x32xf32>
    %209 = arith.mulf %208, %208 : vector<8x32xf32>
    %cst_69 = arith.constant dense<0.000000e+00> : vector<8xf32>
    %210 = vector.multi_reduction <add>, %209, %cst_69 [1] : vector<8x32xf32> to vector<8xf32>
    %211 = vector.shape_cast %210 : vector<8xf32> to vector<8x1xf32>
    %cst_70 = arith.constant 3.200000e+01 : f32
    %212 = vector.broadcast %cst_70 : f32 to vector<8x1xf32>
    %213 = arith.divf %211, %212 : vector<8x1xf32>
    %214 = vector.broadcast %206 : vector<8x1xf32> to vector<8x32xf32>
    %215 = arith.subf %202, %214 : vector<8x32xf32>
    %cst_71 = arith.constant 9.99999974E-6 : f32
    %216 = vector.broadcast %cst_71 : f32 to vector<8x1xf32>
    %217 = arith.addf %213, %216 : vector<8x1xf32>
    %218 = math.rsqrt %217 : vector<8x1xf32>
    %219 = vector.broadcast %218 : vector<8x1xf32> to vector<8x32xf32>
    %220 = arith.mulf %215, %219 : vector<8x32xf32>
    %221 = vector.broadcast %1 : vector<1x32xf32> to vector<8x32xf32>
    %222 = arith.mulf %220, %221 : vector<8x32xf32>
    %223 = vector.broadcast %2 : vector<1x32xf32> to vector<8x32xf32>
    %224 = arith.addf %222, %223 : vector<8x32xf32>
    %225 = arith.addf %34, %224 : vector<8x32xf32>
    %cst_72 = arith.constant dense<0.000000e+00> : vector<8xf32>
    %226 = vector.multi_reduction <add>, %225, %cst_72 [1] : vector<8x32xf32> to vector<8xf32>
    %227 = vector.shape_cast %226 : vector<8xf32> to vector<8x1xf32>
    %cst_73 = arith.constant 3.200000e+01 : f32
    %228 = vector.broadcast %cst_73 : f32 to vector<8x1xf32>
    %229 = arith.divf %227, %228 : vector<8x1xf32>
    %230 = vector.broadcast %229 : vector<8x1xf32> to vector<8x32xf32>
    %231 = arith.subf %225, %230 : vector<8x32xf32>
    %232 = arith.mulf %231, %231 : vector<8x32xf32>
    %cst_74 = arith.constant dense<0.000000e+00> : vector<8xf32>
    %233 = vector.multi_reduction <add>, %232, %cst_74 [1] : vector<8x32xf32> to vector<8xf32>
    %234 = vector.shape_cast %233 : vector<8xf32> to vector<8x1xf32>
    %cst_75 = arith.constant 3.200000e+01 : f32
    %235 = vector.broadcast %cst_75 : f32 to vector<8x1xf32>
    %236 = arith.divf %234, %235 : vector<8x1xf32>
    %237 = vector.broadcast %229 : vector<8x1xf32> to vector<8x32xf32>
    %238 = arith.subf %225, %237 : vector<8x32xf32>
    %cst_76 = arith.constant 9.99999974E-6 : f32
    %239 = vector.broadcast %cst_76 : f32 to vector<8x1xf32>
    %240 = arith.addf %236, %239 : vector<8x1xf32>
    %241 = math.rsqrt %240 : vector<8x1xf32>
    %242 = vector.broadcast %241 : vector<8x1xf32> to vector<8x32xf32>
    %243 = arith.mulf %238, %242 : vector<8x32xf32>
    %244 = vector.broadcast %1 : vector<1x32xf32> to vector<8x32xf32>
    %245 = arith.mulf %243, %244 : vector<8x32xf32>
    %246 = vector.broadcast %2 : vector<1x32xf32> to vector<8x32xf32>
    %247 = arith.addf %245, %246 : vector<8x32xf32>
    %c0_77 = arith.constant 0 : index
    %c0_78 = arith.constant 0 : index
    %248 = vector.load %arg11[%c0_77, %c0_78] : memref<32x32xbf16, #tpu.memory_space<vmem>>, vector<32x32xbf16>
    %249 = arith.truncf %247 : vector<8x32xf32> to vector<8x32xbf16>
    %cst_79 = arith.constant dense<0.000000e+00> : vector<8x32xf32>
    %250 = tpu.matmul %249, %248, %cst_79 {dimension_numbers = #tpu.dot_dimension_numbers<[1], [0], [0], [1], [0, 0, 1, 1], [], []>} : vector<8x32xbf16>, vector<32x32xbf16>, vector<8x32xf32> -> vector<8x32xf32>
    %251 = vector.broadcast %4 : vector<1x32xf32> to vector<8x32xf32>
    %252 = arith.addf %250, %251 : vector<8x32xf32>
    %cst_80 = arith.constant 0.000000e+00 : f32
    %253 = vector.broadcast %cst_80 : f32 to vector<8x32xf32>
    %254 = arith.maximumf %252, %253 : vector<8x32xf32>
    %c0_81 = arith.constant 0 : index
    %c0_82 = arith.constant 0 : index
    %255 = vector.load %arg12[%c0_81, %c0_82] : memref<32x32xbf16, #tpu.memory_space<vmem>>, vector<32x32xbf16>
    %256 = arith.truncf %254 : vector<8x32xf32> to vector<8x32xbf16>
    %cst_83 = arith.constant dense<0.000000e+00> : vector<8x32xf32>
    %257 = tpu.matmul %256, %255, %cst_83 {dimension_numbers = #tpu.dot_dimension_numbers<[1], [0], [0], [1], [0, 0, 1, 1], [], []>} : vector<8x32xbf16>, vector<32x32xbf16>, vector<8x32xf32> -> vector<8x32xf32>
    %258 = vector.broadcast %5 : vector<1x32xf32> to vector<8x32xf32>
    %259 = arith.addf %257, %258 : vector<8x32xf32>
    %cst_84 = arith.constant dense<0.000000e+00> : vector<8xf32>
    %260 = vector.multi_reduction <add>, %259, %cst_84 [1] : vector<8x32xf32> to vector<8xf32>
    %261 = vector.shape_cast %260 : vector<8xf32> to vector<8x1xf32>
    %cst_85 = arith.constant 3.200000e+01 : f32
    %262 = vector.broadcast %cst_85 : f32 to vector<8x1xf32>
    %263 = arith.divf %261, %262 : vector<8x1xf32>
    %264 = vector.broadcast %263 : vector<8x1xf32> to vector<8x32xf32>
    %265 = arith.subf %259, %264 : vector<8x32xf32>
    %266 = arith.mulf %265, %265 : vector<8x32xf32>
    %cst_86 = arith.constant dense<0.000000e+00> : vector<8xf32>
    %267 = vector.multi_reduction <add>, %266, %cst_86 [1] : vector<8x32xf32> to vector<8xf32>
    %268 = vector.shape_cast %267 : vector<8xf32> to vector<8x1xf32>
    %cst_87 = arith.constant 3.200000e+01 : f32
    %269 = vector.broadcast %cst_87 : f32 to vector<8x1xf32>
    %270 = arith.divf %268, %269 : vector<8x1xf32>
    %271 = vector.broadcast %263 : vector<8x1xf32> to vector<8x32xf32>
    %272 = arith.subf %259, %271 : vector<8x32xf32>
    %cst_88 = arith.constant 9.99999974E-6 : f32
    %273 = vector.broadcast %cst_88 : f32 to vector<8x1xf32>
    %274 = arith.addf %270, %273 : vector<8x1xf32>
    %275 = math.rsqrt %274 : vector<8x1xf32>
    %276 = vector.broadcast %275 : vector<8x1xf32> to vector<8x32xf32>
    %277 = arith.mulf %272, %276 : vector<8x32xf32>
    %278 = vector.broadcast %1 : vector<1x32xf32> to vector<8x32xf32>
    %279 = arith.mulf %277, %278 : vector<8x32xf32>
    %280 = vector.broadcast %2 : vector<1x32xf32> to vector<8x32xf32>
    %281 = arith.addf %279, %280 : vector<8x32xf32>
    %282 = arith.addf %225, %281 : vector<8x32xf32>
    %cst_89 = arith.constant 0.000000e+00 : f32
    %283 = vector.broadcast %cst_89 : f32 to vector<8x96xf32>
    %284 = tpu.concatenate %282, %283 in 1 : vector<8x32xf32>, vector<8x96xf32> -> vector<8x128xf32>
    %285 = vector.shape_cast %284 : vector<8x128xf32> to vector<1x8x128xf32>
    %c0_90 = arith.constant 0 : index
    %c0_91 = arith.constant 0 : index
    %c0_92 = arith.constant 0 : index
    %286 = vector.load %arg15[%c0_90, %c0_91, %c0_92] : memref<1x8x128xf32, #tpu.memory_space<vmem>>, vector<1x8x128xf32>
    tpu.vector_store %arg15[%c0_90, %c0_91, %c0_92], %285 {strides = array<i32>} : memref<1x8x128xf32, #tpu.memory_space<vmem>>, vector<1x8x128xf32>,
    return
  }
  func.func @transform_0(%arg0: i32) -> (i32, i32, i32) {
    %c0_i32 = arith.constant 0 : i32
    %c0_i32_0 = arith.constant 0 : i32
    %c0_i32_1 = arith.constant 0 : i32
    return %arg0, %c0_i32, %c0_i32_0 : i32, i32, i32
  }
  func.func @transform_1(%arg0: i32) -> (i32, i32, i32) {
    %c0_i32 = arith.constant 0 : i32
    %c0_i32_0 = arith.constant 0 : i32
    %c0_i32_1 = arith.constant 0 : i32
    return %arg0, %c0_i32, %c0_i32_0 : i32, i32, i32
  }
  func.func @transform_2(%arg0: i32) -> (i32, i32, i32) {
    %c0_i32 = arith.constant 0 : i32
    %c0_i32_0 = arith.constant 0 : i32
    %c0_i32_1 = arith.constant 0 : i32
    return %arg0, %c0_i32, %c0_i32_0 : i32, i32, i32
  }
  func.func @transform_3(%arg0: i32) -> (i32, i32, i32, i32) {
    %c0_i32 = arith.constant 0 : i32
    %c0_i32_0 = arith.constant 0 : i32
    %c0_i32_1 = arith.constant 0 : i32
    %c0_i32_2 = arith.constant 0 : i32
    return %arg0, %c0_i32, %c0_i32_0, %c0_i32_1 : i32, i32, i32, i32
  }
  func.func @transform_4(%arg0: i32) -> (i32, i32) {
    %c0_i32 = arith.constant 0 : i32
    %c0_i32_0 = arith.constant 0 : i32
    %c0_i32_1 = arith.constant 0 : i32
    return %c0_i32, %c0_i32_0 : i32, i32
  }
  func.func @transform_5(%arg0: i32) -> (i32, i32) {
    %c0_i32 = arith.constant 0 : i32
    %c0_i32_0 = arith.constant 0 : i32
    %c0_i32_1 = arith.constant 0 : i32
    return %c0_i32, %c0_i32_0 : i32, i32
  }
  func.func @transform_6(%arg0: i32) -> (i32, i32) {
    %c0_i32 = arith.constant 0 : i32
    %c0_i32_0 = arith.constant 0 : i32
    %c0_i32_1 = arith.constant 0 : i32
    return %c0_i32, %c0_i32_0 : i32, i32
  }
  func.func @transform_7(%arg0: i32) -> (i32, i32) {
    %c0_i32 = arith.constant 0 : i32
    %c0_i32_0 = arith.constant 0 : i32
    %c0_i32_1 = arith.constant 0 : i32
    return %c0_i32, %c0_i32_0 : i32, i32
  }
  func.func @transform_8(%arg0: i32) -> (i32, i32) {
    %c0_i32 = arith.constant 0 : i32
    %c0_i32_0 = arith.constant 0 : i32
    %c0_i32_1 = arith.constant 0 : i32
    return %c0_i32, %c0_i32_0 : i32, i32
  }
  func.func @transform_9(%arg0: i32) -> (i32, i32) {
    %c0_i32 = arith.constant 0 : i32
    %c0_i32_0 = arith.constant 0 : i32
    %c0_i32_1 = arith.constant 0 : i32
    return %c0_i32, %c0_i32_0 : i32, i32
  }
  func.func @transform_10(%arg0: i32) -> (i32, i32) {
    %c0_i32 = arith.constant 0 : i32
    %c0_i32_0 = arith.constant 0 : i32
    %c0_i32_1 = arith.constant 0 : i32
    return %c0_i32, %c0_i32_0 : i32, i32
  }
  func.func @transform_11(%arg0: i32) -> (i32, i32) {
    %c0_i32 = arith.constant 0 : i32
    %c0_i32_0 = arith.constant 0 : i32
    %c0_i32_1 = arith.constant 0 : i32
    return %c0_i32, %c0_i32_0 : i32, i32
  }
  func.func @transform_12(%arg0: i32) -> (i32, i32) {
    %c0_i32 = arith.constant 0 : i32
    %c0_i32_0 = arith.constant 0 : i32
    %c0_i32_1 = arith.constant 0 : i32
    return %c0_i32, %c0_i32_0 : i32, i32
  }
  func.func @transform_13(%arg0: i32) -> (i32, i32) {
    %c0_i32 = arith.constant 0 : i32
    %c0_i32_0 = arith.constant 0 : i32
    %c0_i32_1 = arith.constant 0 : i32
    return %c0_i32, %c0_i32_0 : i32, i32
  }
  func.func @transform_14(%arg0: i32) -> (i32, i32, i32) {
    %c0_i32 = arith.constant 0 : i32
    %c0_i32_0 = arith.constant 0 : i32
    %c0_i32_1 = arith.constant 0 : i32
    return %arg0, %c0_i32, %c0_i32_0 : i32, i32, i32
  }
}

</mosaic_0001>

<bundles_post_ra>
// kernel: tpu_custom_call.1
= control target key start
LH: loop header
LB: loop body
LE: loop exit
PB: predicated region body
PF: predicated region fallthrough
CT: control target
= control target key end

     0   :  { %s4014_s0 = inlined_call_operand.hbm [shape: f32[2,8,32], index: 0, kind: input, shape index: {}]   ;;  %s4015_s1 = inlined_call_operand.hbm [shape: f32[2,8,32], index: 1, kind: input, shape index: {}]   ;;  %s4016_s2 = inlined_call_operand.hbm [shape: f32[2,8,32], index: 2, kind: input, shape index: {}]   ;;  %s4017_s3 = inlined_call_operand.hbm [shape: bf16[2,8,8,32], index: 3, kind: input, shape index: {}]   ;;  %s4018_s4 = inlined_call_operand.hbm [shape: bf16[32,32], index: 4, kind: input, shape index: {}]   ;;  %s4019_s5 = inlined_call_operand.hbm [shape: bf16[32,32], index: 5, kind: input, shape index: {}]   ;;  %s4020_s6 = inlined_call_operand.hbm [shape: bf16[32,32], index: 6, kind: input, shape index: {}]   ;;  %s4021_s7 = inlined_call_operand.hbm [shape: bf16[32,32], index: 7, kind: input, shape index: {}]   ;;  %s4022_s8 = inlined_call_operand.hbm [shape: bf16[32,32], index: 8, kind: input, shape index: {}]   ;;  %s4023_s9 = inlined_call_operand.vmem [shape: bf16[32,32], index: 9, kind: input, shape index: {}]   ;;  %s4024_s10 = inlined_call_operand.hbm [shape: bf16[32,32], index: 10, kind: input, shape index: {}]   ;;  %s4025_s11 = inlined_call_operand.hbm [shape: bf16[32,32], index: 11, kind: input, shape index: {}]   ;;  %s4026_s12 = inlined_call_operand.hbm [shape: f32[5,32], index: 12, kind: input, shape index: {}]   ;;  %s4027_s13 = inlined_call_operand.vmem [shape: f32[4,32], index: 13, kind: input, shape index: {}]   ;;  %s4028_s14 = inlined_call_operand.hbm [shape: f32[2,8,128], index: 14, kind: output, shape index: {}]  }
   0x1   :  { %4056 = sst [smem:[#allocation41_spill]] %s4015_s1 }
   0x2   :  { %4057 = sst [smem:[#allocation42_spill]] %s4018_s4 }
   0x3   :  { %4058 = sst [smem:[#allocation43_spill]] %s4019_s5 }
   0x4   :  { %4059 = sst [smem:[#allocation44_spill]] %s4021_s7 }
   0x5   :  { %4060 = sst [smem:[#allocation45_spill]] %s4023_s9 }
   0x6   :  { %4061 = sst [smem:[#allocation46_spill]] %s4024_s10 }
   0x7   :  { %4062 = sst [smem:[#allocation47_spill]] %s4027_s13 }
   0x8   :  { %4063 = sst [smem:[#allocation48_spill]] %s4028_s14 }
   0x9   :  { %19 = vsyncpa [#allocation3], 0 }
   0xa   :  { %21 = vsyncpa [#allocation3 + $0x1], 0 }
   0xb   :  { %22 = vsyncpa [#allocation6], 0 }
   0xc   :  { %24 = vsyncpa [#allocation6 + $0x1], 0 }
   0xd   :  { %25 = vsyncpa [#allocation9], 0 }
   0xe   :  { %27 = vsyncpa [#allocation9 + $0x1], 0 }
   0xf   :  { %28 = vsyncpa [#allocation12], 0 }
  0x10   :  { %29 = vsyncpa [#allocation15], 0 }
  0x11   :  { %30 = vsyncpa [#allocation18], 0 }
  0x12   :  { %31 = vsyncpa [#allocation21], 0 }
  0x13   :  { %32 = vsyncpa [#allocation4], 0 }
  0x14   :  { %34 = vsyncpa [#allocation4 + $0x1], 0  ;;  %s3249_s29 = smov 0   ;;  %s3251_s30 = smov 0  }
  0x15   :  { %s3253_s15 = smov 0   ;;  %s3255_s16 = smov 0  }
  0x16 LB: > { %4064 = sst [smem:[#allocation32_spill]] %s3141_s29  ;;  %s3155_s17 = smov [#allocation10]   ;;  %s3153_s16 = sphi %s3255_s16, %s4123_s16   ;;  %s3149_s15 = sphi %s3253_s15, %s4126_s15   ;;  %s3145_s30 = sphi %s3251_s30, %s4125_s30   ;;  %s3141_s29 = sphi %s3249_s29, %s4124_s29  }
  0x17   : > { %4065 = sst [smem:[#allocation33_spill]] %s3145_s30  ;;  %s397_s18 = sshll.u32 %s3155_s17, 4  ;;  %s398_s18 = int_to_ptr.vmem [resolvable:$true] %s397_s18 }
  0x18   : > { %4066 = sst [smem:[#allocation34_spill]] %s3149_s15  ;;  %s3270_s19 = sadd.s32 4294967295, %s3153_s16  }
  0x19   : > { %4067 = sst [smem:[#allocation35_spill]] %s3270_s19  ;;  %p2295_p0 = scmp.ge.s32.totalorder %s3153_s16, 1 }
  0x1a   : > { %p4042_p1 = scmp.eq.s32.totalorder %s3270_s19, 0  ;;  %p385_p2 = scmp.lt.s32.totalorder %s3153_s16, 3 }
  0x1b   : > { %s3156_s21 = smov [#allocation11]   ;;  %s3157_s24 = smov [#allocation14]  }
  0x1c   : > { %p3275_p3 = pnand %p2295_p0, %p385_p2  ;;  %s410_s22 = sshll.u32 %s3156_s21, 4  ;;  %s3288_s22 = int_to_ptr.vmem [resolvable:$true] %s410_s22 }
  0x1d   : > { %s436_s25 = sshll.u32 %s3157_s24, 4  ;;  %s2752_s27 = scalar_lea.vmem %s398_s18, 256  ;;  %s3290_s25 = int_to_ptr.vmem [resolvable:$true] %s436_s25 }
  0x1e   : > { %s4068_s20 = scalar_select %p3275_p3, 1, 0 }
  0x1f   : > { %p2572_p5 = pneg %p3275_p3  ;;  %p2753_p8 = scmp.ne.s32.totalorder %s398_s18, %s2752_s27 }
  0x20   : > { %p2760_p11 = scmp.lt.s32.totalorder %s398_s18, %s398_s18  ;;  %p2761_p12 = scmp.lt.s32.totalorder %s2752_s27, %s2752_s27 }
  0x21   : > { %p3284_p6 = pnand %p2572_p5, %p4042_p1 }
  0x22   : > { %p2762_p13 = por %p2761_p12, %p2760_p11 }
  0x23   : > { %s4069_s23 = scalar_select %p3284_p6, 1, 0 }
  0x24   : > { %p3294_p7 = pneg %p3284_p6 }
  0x26   : > { %s4070_s26 = scalar_select %p3294_p7, 1, 0 }
  0x27   : > { %p2755_p9 = pnand %p2753_p8, %p3294_p7 }
  0x29   : > { %p2756_p10 = pneg %p2755_p9 }
  0x2b   : > { %p2763_p0 = pnand %p2762_p13, %p2756_p10 }
  0x2d   : > { %2766 = shalt.err (!%p2763_p0)
}
  0x2e   : > { %s4030_s28 = smov 64   ;;  %s4032_s17 = smov 4  }
  0x2f   : > { %s4071_s4 = sld [smem:[#allocation42_spill]]  ;;  %s2778_s14 = scalar_lea.vmem %s3288_s22, 256 }
  0x30   : > { %p2779_p2 = scmp.ne.s32.totalorder %s3288_s22, %s2778_s14  ;;  %p2786_p9 = scmp.lt.s32.totalorder %s3288_s22, %s3288_s22 }
  0x31   : > { %p2787_p10 = scmp.lt.s32.totalorder %s2778_s14, %s2778_s14 }
  0x32   : > { %p2781_p5 = pnand %p2779_p2, %p3294_p7 }
  0x33   : > { %p2788_p11 = por %p2787_p10, %p2786_p9 }
  0x34   : > { %p2782_p8 = pneg %p2781_p5 }
  0x35   : > { %2575 = dma.hbm_to_vmem [thread:$0]  (!%p3284_p6), %s4071_s4, 256, %s398_s18, [#allocation9], %s4030_s28, %s4030_s28, %s4032_s17  }
  0x36   : > { %p2789_p12 = pnand %p2788_p11, %p2782_p8 }
  0x38   : > { %2792 = shalt.err (!%p2789_p12)
}
  0x39   : > { %s4072_s5 = sld [smem:[#allocation43_spill]]  ;;  %s2804_s18 = scalar_lea.vmem %s3290_s25, 256 }
  0x3a   : > { %p2805_p13 = scmp.ne.s32.totalorder %s3290_s25, %s2804_s18  ;;  %p2812_p5 = scmp.lt.s32.totalorder %s3290_s25, %s3290_s25 }
  0x3b   : > { %p2813_p8 = scmp.lt.s32.totalorder %s2804_s18, %s2804_s18 }
  0x3c   : > { %p2807_p0 = pnand %p2805_p13, %p3294_p7 }
  0x3d   : > { %p2814_p9 = por %p2813_p8, %p2812_p5 }
  0x3e   : > { %p2808_p2 = pneg %p2807_p0 }
  0x3f   : > { %2578 = dma.hbm_to_vmem [thread:$0]  (!%p3284_p6), %s4072_s5, 256, %s3288_s22, [#allocation12], %s4030_s28, %s4030_s28, %s4032_s17  }
  0x40   : > { %p2815_p10 = pnand %p2814_p9, %p2808_p2 }
  0x42   : > { %2818 = shalt.err (!%p2815_p10)
}
  0x43   : > { %s4073_s7 = sld [smem:[#allocation44_spill]]  ;;  %s3160_s22 = smov [#allocation17]  }
  0x44   : > { %s465_s27 = sshll.u32 %s3160_s22, 4  ;;  %s466_s27 = int_to_ptr.vmem [resolvable:$true] %s465_s27 }
  0x45   : > { %s2830_s21 = scalar_lea.vmem %s466_s27, 256  ;;  %p2838_p0 = scmp.lt.s32.totalorder %s466_s27, %s466_s27 }
  0x46   : > { %p2831_p11 = scmp.ne.s32.totalorder %s466_s27, %s2830_s21  ;;  %p2839_p2 = scmp.lt.s32.totalorder %s2830_s21, %s2830_s21 }
  0x48   : > { %p2833_p12 = pnand %p2831_p11, %p3294_p7  ;;  %p2840_p5 = por %p2839_p2, %p2838_p0 }
  0x49   : > { %2584 = dma.hbm_to_vmem [thread:$0]  (!%p3284_p6), %s4073_s7, 256, %s3290_s25, [#allocation15], %s4030_s28, %s4030_s28, %s4032_s17  }
  0x4a   : > { %p2834_p13 = pneg %p2833_p12 }
  0x4c   : > { %p2841_p8 = pnand %p2840_p5, %p2834_p13 }
  0x4e   : > { %2844 = shalt.err (!%p2841_p8)
}
  0x4f   : > { %s4074_s10 = sld [smem:[#allocation46_spill]]  ;;  %s2294_s14 = sadd.s32 4294967294, %s3153_s16  }
  0x50   : > { %s3350_s24 = sadd.s32 1, %s3153_s16   ;;  %s47_s21 = sadd.s32 1, %s3149_s15 }
  0x51   : > { %4075 = sst [smem:[#allocation36_spill]] %s3350_s24  ;;  %s44_s22 = ssub.s32 %s3153_s16, %s3350_s24 }
  0x52   : > { %p45_p9 = scmp.eq.s32.totalorder %s44_s22, 0  ;;  %p54_p10 = scmp.ne.s32.totalorder %s3149_s15, %s3145_s30 }
  0x53   : > { %p55_p11 = scmp.eq.s32.totalorder %s3153_s16, 0  ;;  %p60_p12 = scmp.ne.s32.totalorder %s3145_s30, %s3141_s29 }
  0x54   : > { %s3361_s18 = scalar_select %p45_p9, %s3149_s15, %s47_s21  }
  0x55   : > { %2590 = dma.hbm_to_vmem [thread:$0]  (!%p3284_p6), %s4074_s10, 256, %s466_s27, [#allocation18], %s4030_s28, %s4030_s28, %s4032_s17  }
  0x56   : > { %4076 = sst [smem:[#allocation37_spill]] %s3361_s18  ;;  %p56_p13 = por %p55_p11, %p54_p10 }
  0x57   : > { %p3365_p0 = por %p4042_p1, %p60_p12  ;;  %p372_p2 = scmp.eq.s32.totalorder %s3270_s19, 1 }
  0x58   : > { %p378_p5 = scmp.eq.s32.totalorder %s2294_s14, 1  ;;  %p2622_p8 = scmp.lt.s32.totalorder %s3153_s16, 2 }
  0x59   : > { %s4077_s25 = scalar_select %p3365_p0, 1, 0 }
  0x5a   : > { %s3372_s27 = sand.u32 1, %s3149_s15   ;;  %p3374_p4 = por %p372_p2, %p54_p10 }
  0x5b   : > { %4078 = sst [smem:[#allocation38_spill]] %s4077_s25  ;;  %p3378_p9 = por %p378_p5, %p60_p12 }
  0x5c   : > { %s4079_s22 = scalar_select %p3374_p4, 1, 0 }
  0x5d   : > { %s4081_s21 = scalar_select %p3378_p9, 1, 0 }
  0x5e   : > { %4080 = sst [smem:[#allocation39_spill]] %s4079_s22  ;;  %s3383_s28 = sshll.u32 %s3372_s27, 3 }
  0x5f   : > { %4082 = sst [smem:[#allocation40_spill]] %s4081_s21  ;;  %s3386_s17 = sshll.u32 %s3153_s16, 7 }
  0x60   : > { %p3388_p11 = pnand %p2622_p8, %p56_p13  ;;  %s4043_s4 = sand.u32 1, %s3153_s16  }
  0x61   : > { %s4084_s1 = sld [smem:[#allocation41_spill]]  ;;  %s528_s18 = scalar_lea.vmem [#allocation5], %s3383_s28 }
  0x62   : > { %s535_s15 = sshll.u32 %s528_s18, 4  ;;  %s2311_s24 = sshll.u32 %s3372_s27, 5  ;;  %s536_s15 = int_to_ptr.vmem [resolvable:$true] %s535_s15 }
  0x63   : > { %s3403_s21 = scalar_lea.sflag [#allocation6], %s4043_s4  ;;  %p3409_p12 = pneg %p3388_p11 }
  0x67   : > { %s3397_s10 = scalar_lea.hbm %s4084_s1, %s3386_s17  ;;  %s2850_s18 = scalar_lea.hbm %s4084_s1, 256 }
  0x68   : > { %s2845_s29 = scalar_lea.hbm %s3397_s10, 128  ;;  %p2851_p5 = scmp.lt.s32.totalorder %s3397_s10, %s4084_s1 }
  0x69   : > { %p2846_p10 = scmp.ne.s32.totalorder %s3397_s10, %s2845_s29  ;;  %p2852_p8 = scmp.lt.s32.totalorder %s2850_s18, %s2845_s29 }
  0x6b   : > { %p2848_p13 = pnand %p3409_p12, %p2846_p10  ;;  %p2853_p1 = por %p2852_p8, %p2851_p5 }
  0x6d   : > { %p2849_p2 = pneg %p2848_p13 }
  0x6f   : > { %p2854_p9 = pnand %p2853_p1, %p2849_p2 }
  0x71   : > { %2857 = shalt.err (!%p2854_p9)
}
  0x72   : > { %s2858_s4 = scalar_lea.vmem %s536_s15, 128  ;;  %s3161_s19 = smov [#allocation5]  }
  0x73   : > { %p2859_p4 = scmp.ne.s32.totalorder %s536_s15, %s2858_s4  ;;  %s2863_s25 = sshll.u32 %s3161_s19, 4  ;;  %s2864_s25 = int_to_ptr.vmem [resolvable:$false] %s2863_s25 }
  0x74   : > { %s2865_s30 = scalar_lea.vmem %s2864_s25, 256  ;;  %p2866_p10 = scmp.lt.s32.totalorder %s536_s15, %s2864_s25 }
  0x75   : > { %p2861_p0 = pnand %p2859_p4, %p3409_p12  ;;  %p2867_p13 = scmp.lt.s32.totalorder %s2865_s30, %s2858_s4 }
  0x77   : > { %p2862_p3 = pneg %p2861_p0  ;;  %p2868_p6 = por %p2867_p13, %p2866_p10 }
  0x79   : > { %p2869_p7 = pnand %p2868_p6, %p2862_p3 }
  0x7b   : > { %2872 = shalt.err (!%p2869_p7)
}
  0x7c   : > { %2603 = dma.hbm_to_vmem [thread:$0]  (!%p3388_p11), %s3397_s10, 128, %s536_s15, %s3403_s21  }
  0x7d   : > { %s564_s9 = scalar_lea.vmem [#allocation8], %s2311_s24  ;;  %s3162_s29 = smov [#allocation13]  }
  0x7e   : > { %s571_s13 = sshll.u32 %s564_s9, 4  ;;  %s423_s5 = sshll.u32 %s3162_s29, 4  ;;  %s3428_s13 = int_to_ptr.vmem [resolvable:$true] %s571_s13  ;;  %s424_s5 = int_to_ptr.vmem [resolvable:$true] %s423_s5 }
  0x7f   : > { %s2884_s19 = scalar_lea.vmem %s424_s5, 256  ;;  %p4086_p4 = scmp.ne.s32.totalorder %s4070_s26, 0 }
  0x80   : > { %p2885_p1 = scmp.ne.s32.totalorder %s424_s5, %s2884_s19  ;;  %p2892_p3 = scmp.lt.s32.totalorder %s424_s5, %s424_s5 }
  0x81   : > { %p2893_p6 = scmp.lt.s32.totalorder %s2884_s19, %s2884_s19 }
  0x82   : > { %p2887_p0 = pnand %p2885_p1, %p4086_p4 }
  0x83   : > { %p2894_p7 = por %p2893_p6, %p2892_p3 }
  0x84   : > { %p2888_p9 = pneg %p2887_p0 }
  0x86   : > { %p2895_p2 = pnand %p2894_p7, %p2888_p9 }
  0x88   : > { %2898 = shalt.err (!%p2895_p2)
}
  0x89   : > { %p4087_p5 = scmp.ne.s32.totalorder %s4069_s23, 0  ;;  %s4088_s4 = smov 4  }
  0x8a   : > { %s4089_s10 = smov 64   ;;  %s3163_s24 = smov [#allocation16]  }
  0x8b   : > { %2581 = dma.hbm_to_vmem [thread:$0]  (!%p4087_p5), %s4020_s6, 256, %s424_s5, [#allocation12], %s4089_s10, %s4089_s10, %s4088_s4  }
  0x8c   : > { %s449_s25 = sshll.u32 %s3163_s24, 4  ;;  %s3164_s7 = smov [#allocation19]   ;;  %s450_s25 = int_to_ptr.vmem [resolvable:$true] %s449_s25 }
  0x8d   : > { %s478_s18 = sshll.u32 %s3164_s7, 4  ;;  %s2910_s9 = scalar_lea.vmem %s450_s25, 256  ;;  %s479_s18 = int_to_ptr.vmem [resolvable:$true] %s478_s18 }
  0x8e   : > { %p2911_p8 = scmp.ne.s32.totalorder %s450_s25, %s2910_s9  ;;  %p2918_p1 = scmp.lt.s32.totalorder %s450_s25, %s450_s25 }
  0x8f   : > { %p2919_p0 = scmp.lt.s32.totalorder %s2910_s9, %s2910_s9 }
  0x90   : > { %p2913_p10 = pnand %p2911_p8, %p4086_p4 }
  0x91   : > { %p2920_p9 = por %p2919_p0, %p2918_p1 }
  0x92   : > { %p2914_p13 = pneg %p2913_p10 }
  0x94   : > { %p2921_p3 = pnand %p2920_p9, %p2914_p13 }
  0x96   : > { %2924 = shalt.err (!%p2921_p3)
}
  0x97   : > { %2587 = dma.hbm_to_vmem [thread:$0]  (!%p4087_p5), %s4022_s8, 256, %s450_s25, [#allocation15], %s4089_s10, %s4089_s10, %s4088_s4  }
  0x98   : > { %s2936_s19 = scalar_lea.vmem %s479_s18, 256  ;;  %p2944_p8 = scmp.lt.s32.totalorder %s479_s18, %s479_s18 }
  0x99   : > { %p2937_p6 = scmp.ne.s32.totalorder %s479_s18, %s2936_s19  ;;  %p2945_p10 = scmp.lt.s32.totalorder %s2936_s19, %s2936_s19 }
  0x9b   : > { %p2939_p7 = pnand %p2937_p6, %p4086_p4  ;;  %p2946_p1 = por %p2945_p10, %p2944_p8 }
  0x9d   : > { %p2940_p2 = pneg %p2939_p7 }
  0x9f   : > { %p2947_p13 = pnand %p2946_p1, %p2940_p2 }
  0xa1   : > { %2950 = shalt.err (!%p2947_p13)
}
  0xa2   : > { %2593 = dma.hbm_to_vmem [thread:$0]  (!%p4087_p5), %s4025_s11, 256, %s479_s18, [#allocation18], %s4089_s10, %s4089_s10, %s4088_s4  }
  0xa3   : > { %s3165_s24 = smov [#allocation20]   ;;  %s3464_s29 = scalar_lea.hbm %s4014_s0, %s3386_s17 }
  0xa4   : > { %s492_s25 = sshll.u32 %s3165_s24, 4  ;;  %s493_s25 = int_to_ptr.vmem [resolvable:$true] %s492_s25 }
  0xa5   : > { %s2962_s5 = scalar_lea.vmem %s493_s25, 128  ;;  %p2970_p6 = scmp.lt.s32.totalorder %s493_s25, %s493_s25 }
  0xa6   : > { %p2963_p0 = scmp.ne.s32.totalorder %s493_s25, %s2962_s5  ;;  %p2971_p7 = scmp.lt.s32.totalorder %s2962_s5, %s2962_s5 }
  0xa8   : > { %p2965_p9 = pnand %p2963_p0, %p4086_p4  ;;  %p2972_p2 = por %p2971_p7, %p2970_p6 }
  0xaa   : > { %p2966_p3 = pneg %p2965_p9 }
  0xac   : > { %p2973_p8 = pnand %p2972_p2, %p2966_p3 }
  0xae   : > { %2976 = shalt.err (!%p2973_p8)
}
  0xaf   : > { %2596 = dma.hbm_to_vmem [thread:$0]  (!%p4087_p5), %s4026_s12, 128, %s493_s25, [#allocation21]  }
  0xb0   : > { %s510_s26 = scalar_lea.vmem [#allocation2], %s3383_s28  ;;  %s3478_s7 = scalar_lea.hbm %s4016_s2, %s3386_s17 }
  0xb1   : > { %s517_s30 = sshll.u32 %s510_s26, 4  ;;  %s507_s23 = scalar_lea.sflag [#allocation3], %s3372_s27  ;;  %s518_s30 = int_to_ptr.vmem [resolvable:$true] %s517_s30 }
  0xb2   : > { %s2977_s9 = scalar_lea.hbm %s3464_s29, 128  ;;  %s2982_s19 = scalar_lea.hbm %s4014_s0, 256 }
  0xb3   : > { %p2978_p4 = scmp.ne.s32.totalorder %s3464_s29, %s2977_s9  ;;  %p2983_p5 = scmp.lt.s32.totalorder %s3464_s29, %s4014_s0 }
  0xb4   : > { %p2984_p13 = scmp.lt.s32.totalorder %s2982_s19, %s2977_s9 }
  0xb5   : > { %p2980_p10 = pnand %p2978_p4, %p3409_p12 }
  0xb6   : > { %p2985_p0 = por %p2984_p13, %p2983_p5 }
  0xb7   : > { %p2981_p1 = pneg %p2980_p10 }
  0xb9   : > { %p2986_p9 = pnand %p2985_p0, %p2981_p1 }
  0xbb   : > { %2989 = shalt.err (!%p2986_p9)
}
  0xbc   : > { %s2990_s17 = scalar_lea.vmem %s518_s30, 128  ;;  %s3166_s27 = smov [#allocation2]  }
  0xbd   : > { %p2991_p3 = scmp.ne.s32.totalorder %s518_s30, %s2990_s17  ;;  %s2995_s26 = sshll.u32 %s3166_s27, 4  ;;  %s2996_s26 = int_to_ptr.vmem [resolvable:$false] %s2995_s26 }
  0xbe   : > { %s2997_s15 = scalar_lea.vmem %s2996_s26, 256  ;;  %p2998_p2 = scmp.lt.s32.totalorder %s518_s30, %s2996_s26 }
  0xbf   : > { %p2993_p6 = pnand %p2991_p3, %p3409_p12  ;;  %p2999_p8 = scmp.lt.s32.totalorder %s2997_s15, %s2990_s17 }
  0xc1   : > { %p2994_p7 = pneg %p2993_p6  ;;  %p3000_p4 = por %p2999_p8, %p2998_p2 }
  0xc3   : > { %p3001_p10 = pnand %p3000_p4, %p2994_p7 }
  0xc5   : > { %3004 = shalt.err (!%p3001_p10)
}
  0xc6   : > { %2600 = dma.hbm_to_vmem [thread:$0]  (!%p3388_p11), %s3464_s29, 128, %s518_s30, %s507_s23  }
  0xc7   : > { %s546_s1 = scalar_lea.vmem [#allocation7], %s3383_s28  ;;  %s2374_s9 = sshll.u32 %s3153_s16, 9 }
  0xc8   : > { %s553_s24 = sshll.u32 %s546_s1, 4  ;;  %s3502_s19 = scalar_lea.hbm %s4017_s3, %s2374_s9  ;;  %s554_s24 = int_to_ptr.vmem [resolvable:$true] %s553_s24 }
  0xc9   : > { %s3005_s25 = scalar_lea.hbm %s3478_s7, 128  ;;  %s3010_s26 = scalar_lea.hbm %s4016_s2, 256 }
  0xca   : > { %p3006_p1 = scmp.ne.s32.totalorder %s3478_s7, %s3005_s25  ;;  %p3011_p0 = scmp.lt.s32.totalorder %s3478_s7, %s4016_s2 }
  0xcb   : > { %p3012_p9 = scmp.lt.s32.totalorder %s3010_s26, %s3005_s25 }
  0xcc   : > { %p3008_p5 = pnand %p3006_p1, %p3409_p12 }
  0xcd   : > { %p3013_p3 = por %p3012_p9, %p3011_p0 }
  0xce   : > { %p3009_p13 = pneg %p3008_p5 }
  0xd0   : > { %p3014_p6 = pnand %p3013_p3, %p3009_p13 }
  0xd2   : > { %3017 = shalt.err (!%p3014_p6)
}
  0xd3   : > { %s3018_s28 = scalar_lea.vmem %s554_s24, 128  ;;  %s3167_s30 = smov [#allocation7]  }
  0xd4   : > { %p3019_p7 = scmp.ne.s32.totalorder %s554_s24, %s3018_s28  ;;  %s3023_s23 = sshll.u32 %s3167_s30, 4  ;;  %s3024_s23 = int_to_ptr.vmem [resolvable:$false] %s3023_s23 }
  0xd5   : > { %s3025_s1 = scalar_lea.vmem %s3024_s23, 256  ;;  %p3026_p4 = scmp.lt.s32.totalorder %s554_s24, %s3024_s23 }
  0xd6   : > { %p3021_p2 = pnand %p3019_p7, %p3409_p12  ;;  %p3027_p10 = scmp.lt.s32.totalorder %s3025_s1, %s3018_s28 }
  0xd8   : > { %p3022_p8 = pneg %p3021_p2  ;;  %p3028_p1 = por %p3027_p10, %p3026_p4 }
  0xda   : > { %p3029_p5 = pnand %p3028_p1, %p3022_p8 }
  0xdc   : > { %3032 = shalt.err (!%p3029_p5)
}
  0xdd   : > { %2606 = dma.hbm_to_vmem [thread:$0]  (!%p3388_p11), %s3478_s7, 128, %s554_s24, %s3403_s21  }
  0xde   : > { %s4090_s9 = sand.u32 1, %s3153_s16   ;;  %s3033_s18 = scalar_lea.hbm %s3502_s19, 512 }
  0xdf   : > { %s561_s5 = scalar_lea.sflag [#allocation9], %s4090_s9  ;;  %p3034_p13 = scmp.ne.s32.totalorder %s3502_s19, %s3033_s18 }
  0xe0   : > { %s3038_s27 = scalar_lea.hbm %s4017_s3, 1024  ;;  %p3039_p3 = scmp.lt.s32.totalorder %s3502_s19, %s4017_s3 }
  0xe1   : > { %p3036_p0 = pnand %p3034_p13, %p3409_p12  ;;  %p3040_p6 = scmp.lt.s32.totalorder %s3038_s27, %s3033_s18 }
  0xe3   : > { %p3037_p9 = pneg %p3036_p0  ;;  %p3041_p7 = por %p3040_p6, %p3039_p3 }
  0xe5   : > { %p3042_p2 = pnand %p3041_p7, %p3037_p9 }
  0xe7   : > { %3045 = shalt.err (!%p3042_p2)
}
  0xe8   : > { %s3046_s21 = scalar_lea.vmem %s3428_s13, 512  ;;  %s3168_s7 = smov [#allocation8]  }
  0xe9   : > { %p3047_p8 = scmp.ne.s32.totalorder %s3428_s13, %s3046_s21  ;;  %s3051_s24 = sshll.u32 %s3168_s7, 4  ;;  %s3052_s24 = int_to_ptr.vmem [resolvable:$false] %s3051_s24 }
  0xea   : > { %s3053_s29 = scalar_lea.vmem %s3052_s24, 1024  ;;  %p3054_p1 = scmp.lt.s32.totalorder %s3428_s13, %s3052_s24 }
  0xeb   : > { %p3049_p4 = pnand %p3047_p8, %p3409_p12  ;;  %p3055_p5 = scmp.lt.s32.totalorder %s3053_s29, %s3046_s21 }
  0xed   : > { %p3050_p10 = pneg %p3049_p4  ;;  %p3056_p13 = por %p3055_p5, %p3054_p1 }
  0xef   : > { %p3057_p0 = pnand %p3056_p13, %p3050_p10 }
  0xf1   : > { %3060 = shalt.err (!%p3057_p0)
}
  0xf2   : > { %2609 = dma.hbm_to_vmem [thread:$0]  (!%p3388_p11), %s3502_s19, 512, %s3428_s13, %s561_s5, %s4089_s10, %s4089_s10, %s4088_s4  }
  0xf3   : > { %p4091_p12 = scmp.ne.s32.totalorder %s4068_s20, 0 }
  0xf4   : > { %s4092_s22 = sld [smem:[#allocation33_spill]] (!%p4091_p12) }
  0xf5   : > { %583 = sbr.rel (%p4091_p12) target bundleno = 2829 (0xb0d), region = 76  ;;  %s4093_s28 = sld [smem:[#allocation38_spill]] (!%p4091_p12) }
  0xfa   : > { %s3549_s30 = sand.u32 1, %s4092_s22  }
  0xfb   : > { %s3552_s23 = sshll.u32 %s3549_s30, 3  ;;  %s586_s1 = scalar_lea.sflag [#allocation3], %s3549_s30 }
  0xfc   : > { %s589_s14 = scalar_lea.vmem [#allocation2], %s3552_s23  ;;  %p4094_p9 = scmp.ne.s32.totalorder %s4093_s28, 0 }
  0xfe   : > { %3104 = dma.done.wait (%p4094_p9), %s586_s1, 128  }
  0xff   : > { %3106 = vsyncadd (%p4094_p9), %s586_s1, 4294967168  ;;  %s4095_s13 = sld [smem:[#allocation35_spill]]  ;;  %s598_s10 = scalar_lea.vmem [#allocation5], %s3552_s23 }
 0x105   : > { %s594_s20 = sand.u32 1, %s4095_s13  }
 0x106   : > { %s595_s4 = scalar_lea.sflag [#allocation6], %s594_s20 }
 0x107   : > { %3108 = dma.done.wait (%p4094_p9), %s595_s4, 256  }
 0x108   : > { %3110 = vsyncadd (%p4094_p9), %s595_s4, 4294967040  ;;  %s2318_s19 = sshll.u32 %s3549_s30, 5  ;;  %s607_s9 = scalar_lea.vmem [#allocation7], %s3552_s23 }
 0x109   : > { %s613_s5 = scalar_lea.sflag [#allocation9], %s594_s20  ;;  %s3568_s18 = scalar_lea.vmem [#allocation8], %s2318_s19 }
 0x10a   : > { %3112 = dma.done.wait (%p4094_p9), %s613_s5, 512  }
 0x10b   : > { %3114 = vsyncadd (%p4094_p9), %s613_s5, 4294966784  ;;  %p4096_p11 = scmp.eq.s32.totalorder %s4095_s13, 0 }
 0x10d   : > { %3116 = dma.done.wait (%p4096_p11), [#allocation9], 256   ;;  %p4097_p3 = pmov %p4096_p11 }
 0x10f   : > { %3118 = vsyncadd (%p4097_p3), [#allocation9], 4294967040  ;;  %p4098_p6 = pmov %p4097_p3 }
 0x110   : > { %p4099_p7 = pmov %p4097_p3 }
 0x111   : > { %3120 = dma.done.wait (%p4098_p6), [#allocation12], 512  }
 0x112   : > { %3122 = vsyncadd (%p4099_p7), [#allocation12], 4294966784  ;;  %p4100_p2 = pmov %p4097_p3 }
 0x114   : > { %3124 = dma.done.wait (%p4100_p2), [#allocation15], 512   ;;  %p4101_p8 = pmov %p4100_p2 }
 0x115   : > { %p4102_p4 = pmov %p4100_p2 }
 0x116   : > { %3126 = vsyncadd (%p4101_p8), [#allocation15], 4294966784 }
 0x117   : > { %3128 = dma.done.wait (%p4102_p4), [#allocation18], 512   ;;  %p4103_p10 = pmov %p4100_p2 }
 0x118   : > { %p4104_p1 = pmov %p4100_p2 }
 0x119   : > { %3130 = vsyncadd (%p4103_p10), [#allocation18], 4294966784 }
 0x11a   : > { %3132 = dma.done.wait (%p4104_p1), [#allocation21], 128   ;;  %p4105_p5 = pmov %p4104_p1 }
 0x11b   : > { %vm712_vm0 = vcmask 261120   ;;  %v737_v0 = vld [vmem:[%s598_s10] sm:$0xff]  ;;  %v711_v2 = vld [vmem:[%s589_s14] sm:$0xff]  ;;  %vm3170_vm1 = vmmov 0   ;;  %s4114_s27 = sld [smem:[#allocation47_spill]]  ;;  %s2371_s22 = sshll.u32 %s4095_s13, 7 }
 0x11c   : > { %3134 = vsyncadd (%p4105_p5), [#allocation21], 4294967168  ;;  %v2376_v1 = vld [vmem:[%s3568_s18] sm:$0xff]   ;;  %v738_v3 = vsel %vm712_vm0, %v737_v0, 0.0  ;;  %v2391_v6 = vld [vmem:[%s3568_s18 + $0x8] sm:$0xff]   ;;  %v713_v13 = vsel %vm712_vm0, %v711_v2, 0.0 }
 0x11d   : > { %v2377_v4 = vunpack.c.l.bf16 %v2376_v1  ;;  %v2378_v5 = vunpack.c.h.bf16 %v2376_v1  ;;  %v3598_v7 = vld [vmem:[%s3568_s18 + $0x10] sm:$0xff]   ;;  %739 = vadd.xlane.f32.xlu0 %v738_v3  ;;  %v2381_v8 = vunpack.c.l.bf16 %v2391_v6  ;;  %v2382_v9 = vunpack.c.h.bf16 %v2391_v6  ;;  %v3610_v19 = vld [vmem:[%s3568_s18 + $0x18] sm:$0xff]   ;;  %s4115_s21 = sld [smem:[#allocation45_spill]]  ;;  %s707_s28 = scalar_lea.vmem [#allocation22], %s3552_s23 }
 0x11e   : > { %v2385_v10 = vunpack.c.l.bf16 %v3598_v7  ;;  %v2386_v11 = vunpack.c.h.bf16 %v3598_v7  ;;  %v2389_v20 = vunpack.c.l.bf16 %v3610_v19  ;;  %v2390_v21 = vunpack.c.h.bf16 %v3610_v19  ;;  %v3664_v7 = vld [vmem:[%s607_s9] sm:$0xff]  ;;  %s4116_s29 = sld [smem:[#allocation39_spill]]  ;;  %s2082_s1 = sshll.u32 %s707_s28, 4  ;;  %s2083_s1 = int_to_ptr.vmem [resolvable:$true] %s2082_s1 }
 0x11f   : > { %v785_v12 = vsel %vm712_vm0, %v2377_v4, 0.0  ;;  %v788_v14 = vsel %vm712_vm0, %v2378_v5, 0.0  ;;  %v791_v15 = vsel %vm712_vm0, %v2381_v8, 0.0  ;;  %v794_v16 = vsel %vm712_vm0, %v2382_v9, 0.0  ;;  %s4117_s4 = sld [smem:[#allocation48_spill]]  ;;  %s2069_s19 = scalar_lea.sflag [#allocation4], %s3549_s30 }
 0x120   : > { %786 = vadd.xlane.f32.xlu1 %v785_v12  ;;  %v797_v17 = vsel %vm712_vm0, %v2385_v10, 0.0  ;;  %v800_v18 = vsel %vm712_vm0, %v2386_v11, 0.0  ;;  %v803_v22 = vsel %vm712_vm0, %v2389_v20, 0.0  ;;  %v806_v23 = vsel %vm712_vm0, %v2390_v21, 0.0  ;;  %v2678_v12 = vld [vmem:[#allocation11 + $0x8] sm:$0xff]   ;;  %s3061_s9 = scalar_lea.vmem %s2083_s1, 128 }
 0x121   : > { %714 = vadd.xlane.f32.xlu0 %v713_v13  ;;  %v3169_v13 = vmov 0.0   ;;  %p3062_p13 = scmp.ne.s32.totalorder %s2083_s1, %s3061_s9  ;;  %s3173_s13 = smov [#allocation22]  }
 0x122   : > { %2443 = vmatprep.subr.bf16.mxu1 %v3169_v13  ;;  %2435 = vmatprep.subr.bf16.mxu0 %v3169_v13  ;;  %s3065_s23 = sshll.u32 %s3173_s13, 4  ;;  %s3066_s23 = int_to_ptr.vmem [resolvable:$false] %s3065_s23 }
 0x123   : > { %2444 = vmatpush3.bf16.msra.mxu1 %v2678_v12  ;;  %2447 = vmatprep.mubr.msk.bf16.mxu1 %vm3170_vm1, %v3169_v13  ;;  %s3067_s5 = scalar_lea.vmem %s3066_s23, 256  ;;  %p3068_p11 = scmp.lt.s32.totalorder %s2083_s1, %s3066_s23 }
 0x124   : > { %789 = vadd.xlane.f32.xlu1 %v788_v14  ;;  %2445 = vmatprep.subr.bf16.mxu1 %v3169_v13  ;;  %v2679_v14 = vld [vmem:[#allocation10 + $0x8] sm:$0xff]   ;;  %p4118_p0 = scmp.ne.s32.totalorder %s4116_s29, 0  ;;  %p3069_p3 = scmp.lt.s32.totalorder %s3067_s5, %s3061_s9 }
 0x125   : > { %792 = vadd.xlane.f32.xlu0 %v791_v15  ;;  %v2680_v15 = vld [vmem:[#allocation11] sm:$0xff]   ;;  %2436 = vmatpush3.bf16.msra.mxu0 %v2679_v14  ;;  %s3976_s10 = scalar_lea.hbm %s4117_s4, %s2371_s22 }
 0x126   : > { %2437 = vmatprep.subr.bf16.mxu0 %v3169_v13  ;;  %2439 = vmatprep.mubr.msk.bf16.mxu0 %vm3170_vm1, %v3169_v13  ;;  %p3063_p12 = pnand %p3062_p13, %p4118_p0  ;;  %p3070_p6 = por %p3069_p3, %p3068_p11 }
 0x127   : > { %2446 = vmatpush3.bf16.msra.mxu1 %v2680_v15 }
 0x128   : > { %795 = vadd.xlane.f32.xlu1 %v794_v16  ;;  %v2681_v16 = vld [vmem:[#allocation10] sm:$0xff]   ;;  %p3064_p9 = pneg %p3063_p12 }
 0x129   : > { %798 = vadd.xlane.f32.xlu0 %v797_v17  ;;  %2438 = vmatpush3.bf16.msra.mxu0 %v2681_v16  ;;  %v3680_v17 = vld [vmem:[#allocation14 + $0x8] sm:$0xff]   ;;  %v2683_v16 = vld [vmem:[#allocation14] sm:$0xff]  }
 0x12a   : > { %2451 = vmatprep.subr.bf16.mxu0 %v3169_v13  ;;  %2459 = vmatprep.subr.bf16.mxu1 %v3680_v17  ;;  %p3071_p7 = pnand %p3070_p6, %p3064_p9 }
 0x12c   : > { %801 = vadd.xlane.f32.xlu1 %v800_v18 }
 0x12d   : > { %804 = vadd.xlane.f32.xlu0 %v803_v22 }
 0x130   : > { %807 = vadd.xlane.f32.xlu1 %v806_v23 }
 0x1a6   : > { %v740_v24 = vpop.xlane.xlu0 %739 }
 0x1a7   : > { %v741_v25 = vmul.f32 0.03125, %v740_v24 }
 0x1a9   : > { %v787_v26 = vpop.xlane.xlu1 %786  ;;  %v3616_v27 = vsub.f32 %v737_v0, %v741_v25  ;;  %v727_v25 = vlaneseq }
 0x1aa   : > { %v809_v28 = vmul.f32 0.03125, %v787_v26  ;;  %v715_v29 = vpop.xlane.xlu0 %714 }
 0x1ab   : > { %v717_v31 = vmul.f32 0.03125, %v715_v29  ;;  %v743_v32 = vmul.f32 %v3616_v27, %v3616_v27 }
 0x1ac   : > { %v3618_v30 = vsub.f32 %v2377_v4, %v809_v28 }
 0x1ad   : > { %v790_v33 = vpop.xlane.xlu1 %789  ;;  %v3622_v34 = vsub.f32 %v711_v2, %v717_v31  ;;  %v744_v36 = vsel %vm712_vm0, %v743_v32, 0.0 }
 0x1ae   : > { %v810_v35 = vmul.f32 0.03125, %v790_v33  ;;  %v825_v37 = vmul.f32 %v3618_v30, %v3618_v30  ;;  %745 = vadd.xlane.f32.xlu0 %v744_v36  ;;  %v793_v38 = vpop.xlane.xlu0 %792 }
 0x1af   : > { %v811_v40 = vmul.f32 0.03125, %v793_v38  ;;  %v719_v42 = vmul.f32 %v3622_v34, %v3622_v34 }
 0x1b0   : > { %v3627_v39 = vsub.f32 %v2378_v5, %v810_v35  ;;  %v833_v41 = vsel %vm712_vm0, %v825_v37, 0.0  ;;  %v3685_v35 = vshrl.u32 %v727_v25, 7 }
 0x1b1   : > { %v796_v43 = vpop.xlane.xlu1 %795  ;;  %v3632_v44 = vsub.f32 %v2381_v8, %v811_v40  ;;  %v720_v46 = vsel %vm712_vm0, %v719_v42, 0.0 }
 0x1b2   : > { %v812_v45 = vmul.f32 0.03125, %v796_v43  ;;  %v826_v47 = vmul.f32 %v3627_v39, %v3627_v39  ;;  %834 = vadd.xlane.f32.xlu0 %v833_v41  ;;  %721 = vadd.xlane.f32.xlu1 %v720_v46  ;;  %v799_v48 = vpop.xlane.xlu0 %798  ;;  %v3688_v43 = vsub.s32 0, %v3685_v35 }
 0x1b3   : > { %v813_v50 = vmul.f32 0.03125, %v799_v48  ;;  %v827_v52 = vmul.f32 %v3632_v44, %v3632_v44  ;;  %v734_v48 = vsub.s32 1, %v3685_v35 }
 0x1b4   : > { %v3637_v49 = vsub.f32 %v2382_v9, %v812_v45  ;;  %v836_v51 = vsel %vm712_vm0, %v826_v47, 0.0  ;;  %v3690_v45 = vld [vmem:[#allocation20] sm:$0x1f] }
 0x1b5   : > { %v802_v53 = vpop.xlane.xlu1 %801  ;;  %v3642_v54 = vsub.f32 %v2385_v10, %v813_v50  ;;  %v839_v56 = vsel %vm712_vm0, %v827_v52, 0.0 }
 0x1b6   : > { %v814_v55 = vmul.f32 0.03125, %v802_v53  ;;  %v828_v57 = vmul.f32 %v3637_v49, %v3637_v49  ;;  %837 = vadd.xlane.f32.xlu1 %v836_v51  ;;  %840 = vadd.xlane.f32.xlu0 %v839_v56  ;;  %v805_v58 = vpop.xlane.xlu0 %804 }
 0x1b7   : > { %v815_v60 = vmul.f32 0.03125, %v805_v58  ;;  %v829_v62 = vmul.f32 %v3642_v54, %v3642_v54 }
 0x1b8   : > { %v3647_v59 = vsub.f32 %v2386_v11, %v814_v55  ;;  %v842_v61 = vsel %vm712_vm0, %v828_v57, 0.0  ;;  %v754_v11 = vsel %vm712_vm0, %v3664_v7, 0.0  ;;  %v3695_v55 = vrot.slane %v3690_v45, %v3688_v43 }
 0x1b9   : > { %v808_v63 = vpop.xlane.xlu1 %807  ;;  %v3652_v0 = vsub.f32 %v2389_v20, %v815_v60  ;;  %v845_v2 = vsel %vm712_vm0, %v829_v62, 0.0  ;;  %v3700_v60 = vrot.slane %v3690_v45, %v734_v48 }
 0x1ba   : > { %v816_v1 = vmul.f32 0.03125, %v808_v63  ;;  %v830_v3 = vmul.f32 %v3647_v59, %v3647_v59  ;;  %843 = vadd.xlane.f32.xlu1 %v842_v61  ;;  %846 = vadd.xlane.f32.xlu0 %v845_v2 }
 0x1bb   : > { %v831_v6 = vmul.f32 %v3652_v0, %v3652_v0 }
 0x1bc   : > { %v3657_v4 = vsub.f32 %v2390_v21, %v816_v1  ;;  %v848_v5 = vsel %vm712_vm0, %v830_v3, 0.0 }
 0x1bd   : > { %v851_v8 = vsel %vm712_vm0, %v831_v6, 0.0 }
 0x1be   : > { %v832_v9 = vmul.f32 %v3657_v4, %v3657_v4  ;;  %849 = vadd.xlane.f32.xlu1 %v848_v5  ;;  %852 = vadd.xlane.f32.xlu0 %v851_v8 }
 0x1c0   : > { %v854_v10 = vsel %vm712_vm0, %v832_v9, 0.0 }
 0x1c2   : > { %855 = vadd.xlane.f32.xlu1 %v854_v10  ;;  %755 = vadd.xlane.f32.xlu0 %v754_v11 }
 0x237   : > { %v746_v18 = vpop.xlane.xlu0 %745 }
 0x238   : > { %v747_v19 = vmul.f32 0.03125, %v746_v18 }
 0x23a   : > { %v748_v20 = vadd.f32 1e-05, %v747_v19 }
 0x23b   : > { %v722_v21 = vpop.xlane.xlu1 %721  ;;  %v835_v22 = vpop.xlane.xlu0 %834 }
 0x23c   : > { %2694 = vrsqrt.f32 %v748_v20  ;;  %v723_v23 = vmul.f32 0.03125, %v722_v21  ;;  %v857_v24 = vmul.f32 0.03125, %v835_v22 }
 0x23e   : > { %v724_v26 = vadd.f32 1e-05, %v723_v23  ;;  %v865_v28 = vadd.f32 1e-05, %v857_v24 }
 0x23f   : > { %v838_v29 = vpop.xlane.xlu1 %837  ;;  %v841_v31 = vpop.xlane.xlu0 %840 }
 0x240   : > { %2696 = vrsqrt.f32 %v724_v26  ;;  %v858_v32 = vmul.f32 0.03125, %v838_v29  ;;  %v859_v33 = vmul.f32 0.03125, %v841_v31 }
 0x241   : > { %2698 = vrsqrt.f32 %v865_v28 }
 0x242   : > { %v866_v36 = vadd.f32 1e-05, %v858_v32  ;;  %v867_v37 = vadd.f32 1e-05, %v859_v33 }
 0x243   : > { %v844_v38 = vpop.xlane.xlu1 %843  ;;  %v847_v40 = vpop.xlane.xlu0 %846 }
 0x244   : > { %2700 = vrsqrt.f32 %v866_v36  ;;  %v860_v41 = vmul.f32 0.03125, %v844_v38  ;;  %v861_v42 = vmul.f32 0.03125, %v847_v40 }
 0x245   : > { %2702 = vrsqrt.f32 %v867_v37 }
 0x246   : > { %v868_v46 = vadd.f32 1e-05, %v860_v41  ;;  %v869_v47 = vadd.f32 1e-05, %v861_v42 }
 0x247   : > { %v850_v50 = vpop.xlane.xlu1 %849  ;;  %v853_v51 = vpop.xlane.xlu0 %852 }
 0x248   : > { %2704 = vrsqrt.f32 %v868_v46  ;;  %v862_v52 = vmul.f32 0.03125, %v850_v50  ;;  %v863_v53 = vmul.f32 0.03125, %v853_v51 }
 0x249   : > { %v2695_v56 = vpop.eup %2694  ;;  %2706 = vrsqrt.f32 %v869_v47 }
 0x24a   : > { %v870_v57 = vadd.f32 1e-05, %v862_v52  ;;  %v871_v58 = vadd.f32 1e-05, %v863_v53  ;;  %v750_v61 = vmul.f32 %v2695_v56, %v3616_v27 }
 0x24b   : > { %v856_v62 = vpop.xlane.xlu1 %855  ;;  %v756_v63 = vpop.xlane.xlu0 %755 }
 0x24c   : > { %2708 = vrsqrt.f32 %v870_v57  ;;  %v864_v1 = vmul.f32 0.03125, %v856_v62  ;;  %v757_v2 = vmul.f32 0.03125, %v756_v63  ;;  %v751_v3 = vmul.f32 %v750_v61, %v3695_v55  ;;  %v2685_v61 = vld [vmem:[#allocation13] sm:$0xff]  }
 0x24d   : > { %v2697_v5 = vpop.eup %2696  ;;  %2710 = vrsqrt.f32 %v871_v58  ;;  %v2684_v58 = vld [vmem:[#allocation13 + $0x8] sm:$0xff]   ;;  %v3759_v62 = vand.u32 127, %v727_v25  ;;  %v1282_v63 = vadd.s32 16, %v3685_v35  ;;  %v2689_v25 = vld [vmem:[%s4115_s21] sm:$0xff]  }
 0x24e   : > { %v2699_v6 = vpop.eup %2698  ;;  %v872_v8 = vadd.f32 1e-05, %v864_v1  ;;  %v3705_v9 = vsub.f32 %v3664_v7, %v757_v2  ;;  %v752_v10 = vadd.f32 %v751_v3, %v3700_v60  ;;  %v726_v11 = vmul.f32 %v2697_v5, %v3622_v34 }
 0x24f   : > { %v881_v27 = vmul.f32 %v2699_v6, %v3618_v30  ;;  %v1283_v1 = vadd.s32 24, %v3685_v35  ;;  %v1286_v2 = vmul.u32 8, %v3759_v62  ;;  %v1291_v3 = vadd.s32 1, %v3759_v62  ;;  %v2688_v6 = vld [vmem:[%s4115_s21 + $0x8] sm:$0xff]  }
 0x250   : > { %2712 = vrsqrt.f32 %v872_v8  ;;  %v973_v12 = vpack.c.bf16 %v752_v10, %v752_v10  ;;  %v759_v14 = vmul.f32 %v3705_v9, %v3705_v9  ;;  %v731_v15 = vmul.f32 %v3695_v55, %v726_v11 }
 0x251   : > { %v2701_v18 = vpop.eup %2700  ;;  %v889_v30 = vmul.f32 %v881_v27, %v3695_v55  ;;  %vm1289_vm2 = vcmp.ge.s32.totalorder %v1282_v63, %v1286_v2  ;;  %v1292_v5 = vmul.u32 8, %v1291_v3  ;;  %vm1290_vm3 = vcmp.ge.s32.totalorder %v1283_v1, %v1286_v2 }
 0x252   : > { %v2703_v19 = vpop.eup %2702  ;;  %2448 = vmatmul.mubr.msk.bf16.vlgmr.msra.gmra.mxu1 %vm712_vm0, %v973_v12  ;;  %v760_v7 = vsel %vm712_vm0, %v759_v14, 0.0  ;;  %v3716_v20 = vadd.f32 %v3700_v60, %v731_v15  ;;  %v882_v34 = vmul.f32 %v2701_v18, %v3627_v39  ;;  %v1281_v8 = vadd.s32 8, %v3685_v35 }
 0x253   : > { %v883_v21 = vmul.f32 %v2703_v19, %v3632_v44  ;;  %761 = vadd.xlane.f32.xlu1 %v760_v7  ;;  %2460 = vmatpush3.bf16.msra.mxu1 %v3680_v17  ;;  %v897_v39 = vadd.f32 %v889_v30, %v3700_v60  ;;  %vm1295_vm4 = vcmp.lt.s32.totalorder %v1282_v63, %v1292_v5  ;;  %v3171_v10 = vmov 1.0|1.0   ;;  %v2687_v30 = vld [vmem:[#allocation16] sm:$0xff]  }
 0x254   : > { %v909_v22 = vpack.c.bf16 %v3716_v20, %v3716_v20  ;;  %2461 = vmatprep.subr.bf16.mxu1 %v2683_v16  ;;  %v890_v23 = vmul.f32 %v882_v34, %v3695_v55  ;;  %vm1296_vm5 = vcmp.lt.s32.totalorder %v1283_v1, %v1292_v5  ;;  %vm3765_vm6 = vmand %vm1289_vm2, %vm1295_vm4  ;;  %vm1287_vm9 = vcmp.ge.s32.totalorder %v3685_v35, %v1286_v2 }
 0x255   : > { %v2705_v24 = vpop.eup %2704  ;;  %v891_v44 = vmul.f32 %v883_v21, %v3695_v55  ;;  %vm3769_vm7 = vmand %vm1290_vm3, %vm1296_vm5  ;;  %vm1288_vm10 = vcmp.ge.s32.totalorder %v1281_v8, %v1286_v2  ;;  %vm1293_vm11 = vcmp.lt.s32.totalorder %v3685_v35, %v1292_v5  ;;  %vm1294_vm12 = vcmp.lt.s32.totalorder %v1281_v8, %v1292_v5 }
 0x256   : > { %v2707_v26 = vpop.eup %2706  ;;  %v884_v28 = vmul.f32 %v2705_v24, %v3637_v49  ;;  %2440 = vmatmul.mubr.msk.bf16.vlgmr.msra.gmra.mxu0 %vm712_vm0, %v909_v22  ;;  %v898_v29 = vadd.f32 %v890_v23, %v3700_v60  ;;  %vm2349_vm8 = vmpackc.low %vm3769_vm7, %vm3765_vm6  ;;  %v3806_v23 = vld [vmem:[%s4114_s27] sm:$0xf]  ;;  %vm1593_vm5 = vcmask 1041408  }
 0x257   : > { %2462 = vmatpush3.bf16.msra.mxu1 %v2683_v16  ;;  %v885_v17 = vmul.f32 %v2707_v26, %v3642_v54  ;;  %2455 = vmatprep.mubr.msk.bf16.mxu0 %vm3170_vm1, %v3169_v13  ;;  %v899_v36 = vadd.f32 %v891_v44, %v3700_v60  ;;  %vm3780_vm13 = vmand %vm1287_vm9, %vm1293_vm11  ;;  %v913_v26 = vrot.slane %v3806_v23, %v3688_v43  ;;  %vm1770_vm9 = vcmask 261312  }
 0x258   : > { %v3733_v31 = vpack.c.bf16 %v898_v29, %v897_v39  ;;  %v892_v32 = vmul.f32 %v884_v28, %v3695_v55  ;;  %2452 = vmatpush3.bf16.msra.mxu0 %v2684_v58  ;;  %2483 = vmatprep.subr.msk.bf16.mxu1 %vm2349_vm8, %v3171_v10  ;;  %vm3784_vm14 = vmand %vm1288_vm10, %vm1294_vm12  ;;  %vm1814_vm10 = vcmask 1041409   ;;  %vm1817_vm11 = vcmask 1042434  }
 0x259   : > { %v2709_v33 = vpop.eup %2708  ;;  %v893_v54 = vmul.f32 %v885_v17, %v3695_v55  ;;  %2453 = vmatprep.subr.bf16.mxu0 %v3169_v13  ;;  %vm2351_vm15 = vmpackc.low %vm3784_vm14, %vm3780_vm13  ;;  %vm1820_vm12 = vcmask 1043459  }
 0x25a   : > { %v2711_v49 = vpop.eup %2710  ;;  %2463 = vmatprep.mubr.msk.bf16.mxu1 %vm712_vm0, %v3733_v31  ;;  %v900_v37 = vadd.f32 %v892_v32, %v3700_v60  ;;  %v886_v38 = vmul.f32 %v2709_v33, %v3647_v59 }
 0x25b   : > { %v887_v40 = vmul.f32 %v2711_v49, %v3652_v0  ;;  %v901_v47 = vadd.f32 %v893_v54, %v3700_v60 }
 0x25c   : > { %v3743_v41 = vpack.c.bf16 %v900_v37, %v899_v36  ;;  %v894_v42 = vmul.f32 %v886_v38, %v3695_v55  ;;  %2454 = vmatpush3.bf16.msra.mxu0 %v2685_v61 }
 0x25d   : > { %v2713_v46 = vpop.eup %2712  ;;  %v895_v59 = vmul.f32 %v887_v40, %v3695_v55 }
 0x25e   : > { %2464 = vmatmul.mubr.msk.bf16.vlgmr.msra.gmra.mxu1 %vm712_vm0, %v3743_v41  ;;  %v902_v50 = vadd.f32 %v894_v42, %v3700_v60  ;;  %v888_v51 = vmul.f32 %v2713_v46, %v3657_v4  ;;  %v2686_v4 = vld [vmem:[#allocation16 + $0x8] sm:$0xff]  }
 0x25f   : > { %v903_v0 = vadd.f32 %v895_v59, %v3700_v60  ;;  %2471 = vmatprep.subr.bf16.mxu0 %v2686_v4  ;;  %2484 = vmatpush3.bf16.msk.msra.mxu1 %vm2349_vm8, %v3171_v10  ;;  %vm1510_vm8 = vcmask 31744  }
 0x260   : > { %v1103_v52 = vpack.c.bf16 %v902_v50, %v901_v47  ;;  %v896_v53 = vmul.f32 %v888_v51, %v3695_v55  ;;  %2485 = vmatprep.subr.msk.bf16.mxu1 %vm2351_vm15, %v3171_v10 }
 0x262   : > { %2467 = vmatprep.mubr.msk.bf16.mxu1 %vm712_vm0, %v1103_v52  ;;  %v904_v56 = vadd.f32 %v896_v53, %v3700_v60 }
 0x263   : > { %2486 = vmatpush3.bf16.msk.msra.mxu1 %vm2351_vm15, %v3171_v10  ;;  %vm1829_vm15 = vcmask 1046534  }
 0x264   : > { %v1104_v57 = vpack.c.bf16 %v904_v56, %v903_v0  ;;  %2505 = vmatprep.subr.bf16.mxu1 %v3169_v13 }
 0x266   : > { %2468 = vmatmul.mubr.msk.bf16.gmra.mxu1 %vm712_vm0, %v1104_v57 }
 0x2dc   : > { %v762_v12 = vpop.xlane.xlu1 %761 }
 0x2dd   : > { %v763_v14 = vmul.f32 0.03125, %v762_v12 }
 0x2df   : > { %v764_v15 = vadd.f32 1e-05, %v763_v14 }
 0x2e1   : > { %2714 = vrsqrt.f32 %v764_v15 }
 0x2ee   : > { %v2715_v16 = vpop.eup %2714 }
 0x2ef   : > { %v766_v18 = vmul.f32 %v2715_v16, %v3705_v9  ;;  %v3172_v9 = vmov 1966171168  }
 0x2f0   : > { %v1334_v21 = vunpack.c.l.s4 %v3172_v9 }
 0x2f1   : > { %v767_v19 = vmul.f32 %v766_v18, %v3695_v55 }
 0x2f2   : > { %v1335_v22 = vunpack.c.0.s8 %v1334_v21 }
 0x2f3   : > { %v768_v7 = vadd.f32 %v767_v19, %v3700_v60 }
 0x2f4   : > { %v1338_v39 = vsub.s32 %v1335_v22, %v3685_v35 }
 0x2f5   : > { %v1037_v34 = vpack.c.bf16 %v768_v7, %v768_v7 }
 0x2f7   : > { %2456 = vmatmul.mubr.msk.bf16.vlgmr.msra.gmra.mxu0 %vm712_vm0, %v1037_v34 }
 0x2f8   : > { %2472 = vmatpush3.bf16.msra.mxu0 %v2686_v4  ;;  %2475 = vmatprep.mubr.msk.bf16.mxu0 %vm712_vm0, %v3733_v31 }
 0x2f9   : > { %2473 = vmatprep.subr.bf16.mxu0 %v2687_v30 }
 0x2fc   : > { %2474 = vmatpush3.bf16.msra.mxu0 %v2687_v30 }
 0x2ff   : > { %2476 = vmatmul.mubr.msk.bf16.vlgmr.msra.gmra.mxu0 %vm712_vm0, %v3743_v41  ;;  %v977_v41 = vrot.slane %v3806_v23, %v734_v48 }
 0x300   : > { %2479 = vmatprep.mubr.msk.bf16.mxu0 %vm712_vm0, %v1103_v52 }
 0x307   : > { %2480 = vmatmul.mubr.msk.bf16.gmra.mxu0 %vm712_vm0, %v1104_v57 }
 0x312   : > { %v1027_v24 = vpop.f32.mrf.mxu1 }
 0x313   : > { %v1028_v52 = vadd.f32 %v1027_v24, %v977_v41  ;;  %v1040_v41 = vsub.s32 2, %v3685_v35 }
 0x314   : > { %v2449_v28 = vpop.f32.mrf.mxu1 }
 0x316   : > { %v963_v29 = vpop.f32.mrf.mxu0  ;;  %v1030_v44 = vpop.f32.mrf.mxu1 }
 0x317   : > { %v964_v17 = vadd.f32 %v963_v29, %v913_v26 }
 0x318   : > { %v2441_v31 = vpop.f32.mrf.mxu0  ;;  %v2450_v32 = vpop.f32.mrf.mxu1 }
 0x319   : > { %v1332_v33 = vcombine.high %v964_v17, %v964_v17  ;;  %v1339_v49 = vrot.slane %v964_v17, %v1338_v39 }
 0x31a   : > { %v966_v36 = vpop.f32.mrf.mxu0 }
 0x31b   : > { %v1347_v37 = vcombine.high %v1339_v49, %v1339_v49  ;;  %v1346_v38 = vrot.slane %v1332_v33, %v1338_v39  ;;  %v1355_v54 = vrot.slane %v1339_v49, %v1338_v39  ;;  %v1309_v36 = vadd.s32 1, %v3685_v35 }
 0x31c   : > { %v2442_v40 = vpop.f32.mrf.mxu0 }
 0x31d   : > { %v1369_v42 = vrot.slane %v1347_v37, %v1338_v39  ;;  %v1348_v47 = vcombine.high %v1346_v38, %v1346_v38  ;;  %v1377_v50 = vcombine.high %v1355_v54, %v1355_v54  ;;  %v1384_v1 = vrot.slane %v1355_v54, %v3688_v43 }
 0x31e   : > { %v2465_v46 = vpop.f32.mrf.mxu1  ;;  %v1362_v3 = vrot.slane %v1346_v38, %v1338_v39  ;;  %v1307_v37 = vmul.u32 8, %v3685_v35  ;;  %v1310_v38 = vmul.u32 8, %v1309_v36 }
 0x31f   : > { %v1379_v59 = vcombine.high %v1369_v42, %v1369_v42  ;;  %v1317_v57 = vadd.f32 %v2465_v46, %v1028_v52  ;;  %v1392_v58 = vrot.slane %v1377_v50, %v3688_v43  ;;  %v1376_v63 = vrot.slane %v1348_v47, %v1338_v39 }
 0x320   : > { %v1163_v51 = vpop.f32.mrf.mxu1  ;;  %v1388_v2 = vrot.slane %v1369_v42, %v3688_v43  ;;  %v1378_v7 = vcombine.high %v1362_v3, %v1362_v3  ;;  %v1400_v26 = vrot.slane %v1362_v3, %v3688_v43  ;;  %vm1308_vm2 = vcmp.ge.s32.totalorder %v3759_v62, %v1307_v37 }
 0x321   : > { %v1315_v0 = vadd.f32 %v1163_v51, %v1028_v52  ;;  %v1396_v61 = vrot.slane %v1379_v59, %v3688_v43  ;;  %v1423_v14 = vmul.f32 %v1392_v58, %v1317_v57  ;;  %v1380_v16 = vcombine.high %v1376_v63, %v1376_v63 }
 0x322   : > { %v2466_v53 = vpop.f32.mrf.mxu1  ;;  %v1404_v39 = vrot.slane %v1376_v63, %v3688_v43  ;;  %v1408_v29 = vrot.slane %v1378_v7, %v3688_v43  ;;  %vm1311_vm3 = vcmp.lt.s32.totalorder %v3759_v62, %v1310_v38  ;;  %v1041_v42 = vrot.slane %v3806_v23, %v1040_v41 }
 0x323   : > { %v1318_v56 = vadd.f32 %v2466_v53, %v1028_v52  ;;  %v1421_v10 = vmul.f32 %v1384_v1, %v1315_v0  ;;  %v1412_v22 = vrot.slane %v1380_v16, %v3688_v43  ;;  %vm1312_vm4 = vmand %vm1308_vm2, %vm1311_vm3  ;;  %v1200_v47 = vsub.s32 3, %v3685_v35 }
 0x324   : > { %v1166_v4 = vpop.f32.mrf.mxu1  ;;  %v1313_v43 = vsel %vm1312_vm4, 1.0, %v3169_v13  ;;  %vm1832_vm2 = vcmask 1047559  }
 0x325   : > { %v1316_v48 = vadd.f32 %v1166_v4, %v1028_v52  ;;  %v1424_v5 = vmul.f32 %v1396_v61, %v1318_v56  ;;  %v1314_v54 = vpack.c.bf16 %v1313_v43, %v1313_v43 }
 0x326   : > { %v2469_v8 = vpop.f32.mrf.mxu1 }
 0x327   : > { %v1422_v12 = vmul.f32 %v1388_v2, %v1316_v48  ;;  %v1430_v19 = vpack.c.bf16 %v1424_v5, %v1423_v14  ;;  %v1321_v21 = vadd.f32 %v2469_v8, %v1028_v52  ;;  %2529 = vmatprep.subr.msk.bf16.mxu0 %vm1593_vm5, %v1314_v54  ;;  %v1595_v40 = vsel %vm1593_vm5, %v1314_v54, 0 }
 0x328   : > { %v1179_v15 = vpop.f32.mrf.mxu1  ;;  %2496 = vmatpush3.bf16.msra.mxu0 %v1595_v40 }
 0x329   : > { %v1429_v18 = vpack.c.bf16 %v1422_v12, %v1421_v10  ;;  %v1319_v30 = vadd.f32 %v1179_v15, %v1028_v52  ;;  %v1427_v32 = vmul.f32 %v1408_v29, %v1321_v21  ;;  %2513 = vmatprep.subr.bf16.mxu0 %v3169_v13 }
 0x32a   : > { %v2470_v34 = vpop.f32.mrf.mxu1 }
 0x32b   : > { %v1322_v9 = vadd.f32 %v2470_v34, %v1028_v52  ;;  %2487 = vmatprep.mubr.msk.bf16.mxu1 %vm712_vm0, %v1429_v18  ;;  %v1425_v17 = vmul.f32 %v1400_v26, %v1319_v30 }
 0x32c   : > { %v1182_v24 = vpop.f32.mrf.mxu1  ;;  %2488 = vmatmul.mubr.msk.bf16.vlgmr.msra.gmra.mxu1 %vm712_vm0, %v1430_v19 }
 0x32d   : > { %v1320_v28 = vadd.f32 %v1182_v24, %v1028_v52  ;;  %v1428_v44 = vmul.f32 %v1412_v22, %v1322_v9  ;;  %v1201_v52 = vrot.slane %v3806_v23, %v1200_v47  ;;  %2506 = vmatpush3.bf16.msra.mxu1 %v2688_v6 }
 0x32e   : > { %2507 = vmatprep.subr.bf16.mxu1 %v3169_v13 }
 0x32f   : > { %v1426_v31 = vmul.f32 %v1404_v39, %v1320_v28  ;;  %v1432_v49 = vpack.c.bf16 %v1428_v44, %v1427_v32 }
 0x331   : > { %v1431_v33 = vpack.c.bf16 %v1426_v31, %v1425_v17  ;;  %2508 = vmatpush3.bf16.msra.mxu1 %v2689_v25 }
 0x332   : > { %2521 = vmatprep.subr.bf16.mxu1 %v3169_v13 }
 0x333   : > { %2491 = vmatprep.mubr.msk.bf16.mxu1 %vm712_vm0, %v1431_v33 }
 0x334   : > { %2492 = vmatmul.mubr.msk.bf16.gmra.mxu1 %vm712_vm0, %v1432_v49 }
 0x335   : > { %2509 = vmatprep.mubr.msk.bf16.mxu1 %vm3170_vm1, %v3169_v13 }
 0x3b7   : > { %v1091_v46 = vpop.f32.mrf.mxu0 }
 0x3b8   : > { %v1092_v50 = vadd.f32 %v1091_v46, %v1041_v42 }
 0x3b9   : > { %v2457_v51 = vpop.f32.mrf.mxu0 }
 0x3bb   : > { %v1094_v59 = vpop.f32.mrf.mxu0 }
 0x3bd   : > { %v2458_v53 = vpop.f32.mrf.mxu0 }
 0x3bf   : > { %v2477_v0 = vpop.f32.mrf.mxu0 }
 0x3c0   : > { %v1257_v56 = vadd.f32 %v2477_v0, %v1201_v52 }
 0x3c1   : > { %v1248_v57 = vpop.f32.mrf.mxu0 }
 0x3c2   : > { %v1249_v58 = vadd.f32 %v1248_v57, %v1201_v52  ;;  %v3842_v61 = vadd.f32 %v1257_v56, %v1092_v50 }
 0x3c3   : > { %v2478_v4 = vpop.f32.mrf.mxu0 }
 0x3c4   : > { %v1260_v63 = vadd.f32 %v2478_v4, %v1201_v52  ;;  %v3844_v1 = vadd.f32 %v1249_v58, %v1092_v50 }
 0x3c5   : > { %v1251_v48 = vpop.f32.mrf.mxu0 }
 0x3c6   : > { %v1252_v2 = vadd.f32 %v1251_v48, %v1201_v52  ;;  %v3846_v3 = vadd.f32 %v1260_v63, %v1092_v50 }
 0x3c7   : > { %v2481_v5 = vpop.f32.mrf.mxu0 }
 0x3c8   : > { %v1273_v8 = vadd.f32 %v2481_v5, %v1201_v52  ;;  %v3848_v10 = vadd.f32 %v1252_v2, %v1092_v50 }
 0x3c9   : > { %v1264_v23 = vpop.f32.mrf.mxu0 }
 0x3ca   : > { %v1265_v12 = vadd.f32 %v1264_v23, %v1201_v52  ;;  %v3850_v14 = vadd.f32 %v1273_v8, %v1092_v50 }
 0x3cb   : > { %v2482_v15 = vpop.f32.mrf.mxu0 }
 0x3cc   : > { %v1276_v16 = vadd.f32 %v2482_v15, %v1201_v52  ;;  %v3852_v18 = vadd.f32 %v1265_v12, %v1092_v50 }
 0x3cd   : > { %v1267_v19 = vpop.f32.mrf.mxu0 }
 0x3ce   : > { %v1268_v7 = vadd.f32 %v1267_v19, %v1201_v52  ;;  %v3854_v34 = vadd.f32 %v1276_v16, %v1092_v50 }
 0x3d0   : > { %v3856_v30 = vadd.f32 %v1268_v7, %v1092_v50 }
 0x3ec   : > { %v2489_v9 = vpop.f32.mrf.mxu1 }
 0x3ed   : > { %v1513_v49 = vsel %vm1510_vm8, %v2489_v9, -inf }
 0x3ee   : > { %v1479_v21 = vpop.f32.mrf.mxu1 }
 0x3ef   : > { %v1511_v36 = vsel %vm1510_vm8, %v1479_v21, -inf }
 0x3f0   : > { %v2490_v22 = vpop.f32.mrf.mxu1 }
 0x3f1   : > { %v1514_v29 = vsel %vm1510_vm8, %v2490_v22, -inf }
 0x3f2   : > { %v1482_v24 = vpop.f32.mrf.mxu1 }
 0x3f3   : > { %v1512_v37 = vsel %vm1510_vm8, %v1482_v24, -inf }
 0x3f4   : > { %v2493_v26 = vpop.f32.mrf.mxu1 }
 0x3f5   : > { %v1519_v44 = vsel %vm1510_vm8, %v2493_v26, -inf }
 0x3f6   : > { %v1495_v28 = vpop.f32.mrf.mxu1  ;;  %v1520_v43 = vmax.f32 %v1513_v49, %v1519_v44 }
 0x3f7   : > { %v1515_v17 = vsel %vm1510_vm8, %v1495_v28, -inf }
 0x3f8   : > { %v2494_v39 = vpop.f32.mrf.mxu1  ;;  %v1516_v54 = vmax.f32 %v1511_v36, %v1515_v17 }
 0x3f9   : > { %v1521_v31 = vsel %vm1510_vm8, %v2494_v39, -inf }
 0x3fa   : > { %v1522_v32 = vmax.f32 %v1514_v29, %v1521_v31  ;;  %v1498_v33 = vpop.f32.mrf.mxu1 }
 0x3fb   : > { %v1517_v38 = vsel %vm1510_vm8, %v1498_v33, -inf }
 0x3fc   : > { %v1518_v40 = vmax.f32 %v1512_v37, %v1517_v38  ;;  %v1524_v42 = vmax.f32 %v1520_v43, %v1522_v32 }
 0x3fe   : > { %v1523_v46 = vmax.f32 %v1516_v54, %v1518_v40 }
 0x400   : > { %v1525_v50 = vmax.f32 %v1523_v46, %v1524_v42 }
 0x402   : > { %v1526_v51 = vrot.slane %v1525_v50, 4 }
 0x404   : > { %v1527_v59 = vmax.f32 %v1525_v50, %v1526_v51 }
 0x406   : > { %v1528_v52 = vrot.slane %v1527_v59, 2 }
 0x408   : > { %v1529_v53 = vmax.f32 %v1527_v59, %v1528_v52 }
 0x40a   : > { %v1530_v0 = vrot.slane %v1529_v53, 1 }
 0x40c   : > { %v1531_v56 = vmax.f32 %v1529_v53, %v1530_v0 }
 0x40e   : > { %v1532_v57 = vsub.f32 %v1479_v21, %v1531_v56  ;;  %v1533_v58 = vsub.f32 %v1482_v24, %v1531_v56  ;;  %v1534_v4 = vsub.f32 %v2489_v9, %v1531_v56  ;;  %v1535_v63 = vsub.f32 %v2490_v22, %v1531_v56 }
 0x40f   : > { %v1536_v48 = vsub.f32 %v1495_v28, %v1531_v56  ;;  %v1537_v2 = vsub.f32 %v1498_v33, %v1531_v56  ;;  %v1538_v15 = vsub.f32 %v2493_v26, %v1531_v56  ;;  %v1539_v7 = vsub.f32 %v2494_v39, %v1531_v56 }
 0x410   : > { %v1540_v5 = vmul.f32 1.442695, %v1532_v57  ;;  %v1542_v8 = vmul.f32 1.442695, %v1533_v58  ;;  %v1544_v23 = vmul.f32 1.442695, %v1534_v4 }
 0x411   : > { %v1546_v12 = vmul.f32 1.442695, %v1535_v63  ;;  %v1548_v16 = vmul.f32 1.442695, %v1536_v48  ;;  %v1550_v19 = vmul.f32 1.442695, %v1537_v2 }
 0x412   : > { %2716 = vpow2.f32 %v1540_v5  ;;  %v1552_v29 = vmul.f32 1.442695, %v1538_v15  ;;  %v1554_v21 = vmul.f32 1.442695, %v1539_v7  ;;  %v1302_v5 = vsel %vm3784_vm14, 1.0, %v3169_v13 }
 0x413   : > { %2718 = vpow2.f32 %v1542_v8  ;;  %v1301_v8 = vsel %vm3780_vm13, 1.0, %v3169_v13  ;;  %v1303_v15 = vsel %vm3765_vm6, 1.0, %v3169_v13  ;;  %vm1756_vm6 = vcmask 130112  }
 0x414   : > { %2720 = vpow2.f32 %v1544_v23  ;;  %vm1823_vm13 = vcmask 1044484   ;;  %vm1826_vm14 = vcmask 1045509  }
 0x415   : > { %2722 = vpow2.f32 %v1546_v12  ;;  %v1304_v12 = vsel %vm3769_vm7, 1.0, %v3169_v13  ;;  %vm1763_vm7 = vcmask 195712  }
 0x416   : > { %2724 = vpow2.f32 %v1548_v16 }
 0x417   : > { %2726 = vpow2.f32 %v1550_v19 }
 0x418   : > { %2728 = vpow2.f32 %v1552_v29 }
 0x419   : > { %2730 = vpow2.f32 %v1554_v21 }
 0x41f   : > { %v2717_v9 = vpop.eup %2716 }
 0x420   : > { %v2719_v22 = vpop.eup %2718  ;;  %v1556_v24 = vsel %vm1510_vm8, %v2717_v9, 0.0 }
 0x421   : > { %v2721_v28 = vpop.eup %2720  ;;  %v1557_v26 = vsel %vm1510_vm8, %v2719_v22, 0.0  ;;  %v1577_v44 = vpack.c.bf16 %v2719_v22, %v2717_v9  ;;  %v1751_v22 = vadd.s32 4294967288, %v3759_v62 }
 0x422   : > { %v2723_v17 = vpop.eup %2722  ;;  %v1558_v31 = vadd.f32 %v1557_v26, %v1556_v24  ;;  %v1559_v39 = vsel %vm1510_vm8, %v2721_v28, 0.0 }
 0x423   : > { %v2725_v32 = vpop.eup %2724  ;;  %2497 = vmatprep.mubr.msk.bf16.mxu0 %vm1510_vm8, %v1577_v44  ;;  %v1578_v33 = vpack.c.bf16 %v2723_v17, %v2721_v28  ;;  %v1561_v37 = vsel %vm1510_vm8, %v2723_v17, 0.0  ;;  %v1758_v28 = vadd.s32 4294967280, %v3759_v62  ;;  %v1754_v26 = vsub.s32 %v1751_v22, %v3685_v35 }
 0x424   : > { %v2727_v49 = vpop.eup %2726  ;;  %v1560_v36 = vadd.f32 %v1559_v39, %v1558_v31  ;;  %v1563_v40 = vsel %vm1510_vm8, %v2725_v32, 0.0  ;;  %v1749_v17 = vsub.s32 %v3759_v62, %v3685_v35 }
 0x425   : > { %2498 = vmatmul.mubr.msk.bf16.vlgmr.msra.gmra.mxu0 %vm1510_vm8, %v1578_v33  ;;  %v1579_v38 = vpack.c.bf16 %v2727_v49, %v2725_v32  ;;  %v2729_v54 = vpop.eup %2728  ;;  %v1565_v50 = vsel %vm1510_vm8, %v2727_v49, 0.0  ;;  %v1765_v32 = vadd.s32 4294967272, %v3759_v62  ;;  %v1761_v39 = vsub.s32 %v1758_v28, %v3685_v35 }
 0x426   : > { %v1562_v43 = vadd.f32 %v1561_v37, %v1560_v36  ;;  %v2731_v42 = vpop.eup %2730  ;;  %v1567_v59 = vsel %vm1510_vm8, %v2729_v54, 0.0 }
 0x427   : > { %2501 = vmatprep.mubr.msk.bf16.mxu0 %vm1510_vm8, %v1579_v38  ;;  %v1580_v52 = vpack.c.bf16 %v2731_v42, %v2729_v54  ;;  %v1569_v0 = vsel %vm1510_vm8, %v2731_v42, 0.0 }
 0x428   : > { %v1564_v46 = vadd.f32 %v1563_v40, %v1562_v43 }
 0x42a   : > { %v1566_v51 = vadd.f32 %v1565_v50, %v1564_v46  ;;  %v1768_v46 = vsub.s32 %v1765_v32, %v3685_v35 }
 0x42c   : > { %v1568_v53 = vadd.f32 %v1567_v59, %v1566_v51 }
 0x42d   : > { %2502 = vmatmul.mubr.msk.bf16.gmra.mxu0 %vm1510_vm8, %v1580_v52 }
 0x42e   : > { %v1570_v56 = vadd.f32 %v1569_v0, %v1568_v53  ;;  %2517 = vmatprep.mubr.msk.bf16.mxu0 %vm3170_vm1, %v3169_v13 }
 0x430   : > { %v1571_v57 = vrot.slane %v1570_v56, 4 }
 0x432   : > { %v1572_v58 = vadd.f32 %v1571_v57, %v1570_v56 }
 0x434   : > { %v1573_v4 = vrot.slane %v1572_v58, 2 }
 0x436   : > { %v1574_v63 = vadd.f32 %v1573_v4, %v1572_v58 }
 0x438   : > { %v1575_v48 = vrot.slane %v1574_v63, 1 }
 0x43a   : > { %v1576_v2 = vadd.f32 %v1575_v48, %v1574_v63 }
 0x43c   : > { %2732 = vrcp.f32 %v1576_v2 }
 0x449   : > { %v2733_v23 = vpop.eup %2732 }
 0x44a   : > { %v1728_v16 = vmul.f32 %v2733_v23, %v1302_v5  ;;  %v1727_v19 = vmul.f32 %v2733_v23, %v1301_v8  ;;  %v1730_v29 = vmul.f32 %v2733_v23, %v1304_v12  ;;  %v1729_v21 = vmul.f32 %v2733_v23, %v1303_v15 }
 0x44c   : > { %v1734_v7 = vsel %vm1510_vm8, %v1728_v16, 0.0  ;;  %v1731_v27 = vsel %vm1510_vm8, %v1727_v19, 0.0  ;;  %v1740_v11 = vsel %vm1510_vm8, %v1730_v29, 0.0  ;;  %v1737_v9 = vsel %vm1510_vm8, %v1729_v21, 0.0 }
 0x44d   : > { %1735 = vadd.xlane.f32.xlu1 %v1734_v7  ;;  %1732 = vadd.xlane.f32.xlu0 %v1731_v27 }
 0x451   : > { %1741 = vadd.xlane.f32.xlu1 %v1740_v11  ;;  %1738 = vadd.xlane.f32.xlu0 %v1737_v9 }
 0x4d6   : > { %v1733_v24 = vpop.xlane.xlu0 %1732  ;;  %v1736_v44 = vpop.xlane.xlu1 %1735 }
 0x4d7   : > { %v1755_v43 = vrot.slane %v1736_v44, %v1754_v26  ;;  %v1750_v54 = vrot.slane %v1733_v24, %v1749_v17 }
 0x4d9   : > { %v1757_v56 = vsel %vm1756_vm6, %v1755_v43, %v1750_v54 }
 0x4da   : > { %v1739_v49 = vpop.xlane.xlu0 %1738  ;;  %v1742_v59 = vpop.xlane.xlu1 %1741 }
 0x4db   : > { %v1762_v50 = vrot.slane %v1739_v49, %v1761_v39  ;;  %v1769_v48 = vrot.slane %v1742_v59, %v1768_v46 }
 0x4dd   : > { %v1764_v2 = vsel %vm1763_vm7, %v1762_v50, %v1757_v56 }
 0x4de   : > { %v3925_v9 = vsel %vm1770_vm9, %v1769_v48, %v1764_v2 }
 0x4e5   : > { %v2499_v31 = vpop.f32.mrf.mxu0 }
 0x4e6   : > { %v1664_v33 = vmul.f32 %v2499_v31, %v3842_v61 }
 0x4e7   : > { %v1631_v36 = vpop.f32.mrf.mxu0 }
 0x4e8   : > { %v1684_v37 = vsel %vm712_vm0, %v1664_v33, 0.0  ;;  %v1662_v38 = vmul.f32 %v1631_v36, %v3844_v1 }
 0x4e9   : > { %v1685_v40 = vrot.slane %v1684_v37, 4  ;;  %v2500_v42 = vpop.f32.mrf.mxu0 }
 0x4ea   : > { %v1670_v62 = vsel %vm712_vm0, %v1662_v38, 0.0  ;;  %v1665_v51 = vmul.f32 %v2500_v42, %v3846_v3 }
 0x4eb   : > { %v1686_v61 = vadd.f32 %v1685_v40, %v1684_v37  ;;  %v1671_v52 = vrot.slane %v1670_v62, 4  ;;  %v1634_v53 = vpop.f32.mrf.mxu0 }
 0x4ec   : > { %v1691_v1 = vsel %vm712_vm0, %v1665_v51, 0.0  ;;  %v1663_v0 = vmul.f32 %v1634_v53, %v3848_v10 }
 0x4ed   : > { %v1687_v57 = vrot.slane %v1686_v61, 2  ;;  %v1672_v58 = vadd.f32 %v1671_v52, %v1670_v62  ;;  %v1692_v4 = vrot.slane %v1691_v1, 4  ;;  %v2503_v63 = vpop.f32.mrf.mxu0 }
 0x4ee   : > { %v1677_v3 = vsel %vm712_vm0, %v1663_v0, 0.0  ;;  %v1668_v5 = vmul.f32 %v2503_v63, %v3850_v14 }
 0x4ef   : > { %v1688_v8 = vadd.f32 %v1687_v57, %v1686_v61  ;;  %v1673_v23 = vrot.slane %v1672_v58, 2  ;;  %v1693_v12 = vadd.f32 %v1692_v4, %v1691_v1  ;;  %v1678_v15 = vrot.slane %v1677_v3, 4  ;;  %v1647_v16 = vpop.f32.mrf.mxu0 }
 0x4f0   : > { %v1712_v19 = vsel %vm712_vm0, %v1668_v5, 0.0  ;;  %v1666_v10 = vmul.f32 %v1647_v16, %v3852_v18 }
 0x4f1   : > { %v1689_v7 = vrot.slane %v1688_v8, 1  ;;  %v1674_v27 = vadd.f32 %v1673_v23, %v1672_v58  ;;  %v1694_v29 = vrot.slane %v1693_v12, 2  ;;  %v1679_v21 = vadd.f32 %v1678_v15, %v1677_v3  ;;  %v2504_v11 = vpop.f32.mrf.mxu0 }
 0x4f2   : > { %v1713_v6 = vrot.slane %v1712_v19, 4  ;;  %v1698_v14 = vsel %vm712_vm0, %v1666_v10, 0.0  ;;  %v1669_v25 = vmul.f32 %v2504_v11, %v3854_v34 }
 0x4f3   : > { %v1690_v22 = vadd.f32 %v1689_v7, %v1688_v8  ;;  %v1675_v24 = vrot.slane %v1674_v27, 1  ;;  %v1695_v28 = vadd.f32 %v1694_v29, %v1693_v12  ;;  %v1680_v26 = vrot.slane %v1679_v21, 2  ;;  %v1650_v44 = vpop.f32.mrf.mxu0 }
 0x4f4   : > { %v1714_v17 = vadd.f32 %v1713_v6, %v1712_v19  ;;  %v1699_v18 = vrot.slane %v1698_v14, 4  ;;  %v1719_v31 = vsel %vm712_vm0, %v1669_v25, 0.0  ;;  %v1667_v32 = vmul.f32 %v1650_v44, %v3856_v30 }
 0x4f5   : > { %v1775_v39 = vmul.f32 %v3925_v9, %v1690_v22  ;;  %v1676_v33 = vadd.f32 %v1675_v24, %v1674_v27  ;;  %v1696_v49 = vrot.slane %v1695_v28, 1  ;;  %v1681_v36 = vadd.f32 %v1680_v26, %v1679_v21 }
 0x4f6   : > { %v1715_v37 = vrot.slane %v1714_v17, 2  ;;  %v1700_v38 = vadd.f32 %v1699_v18, %v1698_v14  ;;  %v1720_v43 = vrot.slane %v1719_v31, 4  ;;  %v1705_v34 = vsel %vm712_vm0, %v1667_v32, 0.0 }
 0x4f7   : > { %v1697_v54 = vadd.f32 %v1696_v49, %v1695_v28  ;;  %v1682_v40 = vrot.slane %v1681_v36, 1  ;;  %v1706_v62 = vrot.slane %v1705_v34, 4  ;;  %v1787_v51 = vpack.c.bf16 %v1775_v39, %v1775_v39 }
 0x4f8   : > { %v1716_v42 = vadd.f32 %v1715_v37, %v1714_v17  ;;  %v1701_v46 = vrot.slane %v1700_v38, 2  ;;  %v1721_v50 = vadd.f32 %v1720_v43, %v1719_v31  ;;  %v1773_v59 = vmul.f32 %v3925_v9, %v1676_v33 }
 0x4f9   : > { %v1776_v30 = vmul.f32 %v3925_v9, %v1697_v54  ;;  %v1683_v61 = vadd.f32 %v1682_v40, %v1681_v36  ;;  %v1707_v0 = vadd.f32 %v1706_v62, %v1705_v34  ;;  %v1807_v5 = vunpack.c.l.b16 %v1787_v51 }
 0x4fa   : > { %v1717_v52 = vrot.slane %v1716_v42, 1  ;;  %v1702_v53 = vadd.f32 %v1701_v46, %v1700_v38  ;;  %v1722_v1 = vrot.slane %v1721_v50, 2  ;;  %v1785_v2 = vpack.c.bf16 %v1773_v59, %v1773_v59 }
 0x4fb   : > { %v1788_v56 = vpack.c.bf16 %v1776_v30, %v1776_v30  ;;  %v1774_v57 = vmul.f32 %v3925_v9, %v1683_v61  ;;  %v1708_v48 = vrot.slane %v1707_v0, 2  ;;  %v1816_v11 = vrot.slane %v1807_v5, 6 }
 0x4fc   : > { %v1718_v58 = vadd.f32 %v1717_v52, %v1716_v42  ;;  %v1703_v4 = vrot.slane %v1702_v53, 1  ;;  %v1723_v63 = vadd.f32 %v1722_v1, %v1721_v50  ;;  %v1805_v29 = vunpack.c.l.b16 %v1785_v2 }
 0x4fd   : > { %v1786_v3 = vpack.c.bf16 %v1774_v57, %v1774_v57  ;;  %v1709_v12 = vadd.f32 %v1708_v48, %v1707_v0  ;;  %v1808_v15 = vunpack.c.l.b16 %v1788_v56 }
 0x4fe   : > { %v1704_v8 = vadd.f32 %v1703_v4, %v1702_v53  ;;  %v1724_v23 = vrot.slane %v1723_v63, 1  ;;  %v1779_v19 = vmul.f32 %v3925_v9, %v1718_v58 }
 0x4ff   : > { %v1806_v16 = vunpack.c.l.b16 %v1786_v3  ;;  %v1710_v27 = vrot.slane %v1709_v12, 1  ;;  %v1819_v22 = vrot.slane %v1808_v15, 5 }
 0x500   : > { %v1777_v10 = vmul.f32 %v3925_v9, %v1704_v8  ;;  %v1725_v7 = vadd.f32 %v1724_v23, %v1723_v63  ;;  %v1791_v26 = vpack.c.bf16 %v1779_v19, %v1779_v19  ;;  %v2691_v19 = vld [vmem:[#allocation17] sm:$0xff]  }
 0x501   : > { %v1813_v21 = vrot.slane %v1806_v16, 7  ;;  %v1711_v25 = vadd.f32 %v1710_v27, %v1709_v12  ;;  %v2690_v16 = vld [vmem:[#allocation17 + $0x8] sm:$0xff]  }
 0x502   : > { %v1789_v6 = vpack.c.bf16 %v1777_v10, %v1777_v10  ;;  %v1780_v14 = vmul.f32 %v3925_v9, %v1725_v7  ;;  %v1811_v33 = vunpack.c.l.b16 %v1791_v26  ;;  %2514 = vmatpush3.bf16.msra.mxu0 %v2690_v16 }
 0x503   : > { %v1815_v24 = vsel %vm1814_vm10, %v1813_v21, %v1805_v29  ;;  %v1778_v31 = vmul.f32 %v3925_v9, %v1711_v25  ;;  %v1796_v9 = vrot.slane %v3690_v45, %v1040_v41  ;;  %2515 = vmatprep.subr.bf16.mxu0 %v3169_v13  ;;  %v2693_v25 = vld [vmem:[#allocation19] sm:$0xff]  }
 0x504   : > { %v1818_v28 = vsel %vm1817_vm11, %v1816_v11, %v1815_v24  ;;  %v1809_v44 = vunpack.c.l.b16 %v1789_v6  ;;  %v1792_v18 = vpack.c.bf16 %v1780_v14, %v1780_v14  ;;  %v1828_v43 = vrot.slane %v1811_v33, 2 }
 0x505   : > { %v1821_v17 = vsel %vm1820_vm12, %v1819_v22, %v1818_v28  ;;  %v1790_v39 = vpack.c.bf16 %v1778_v31, %v1778_v31  ;;  %v2740_v22 = vld [vmem:[#allocation20] sm:$0x1f] }
 0x506   : > { %v1822_v32 = vrot.slane %v1809_v44, 4  ;;  %v1812_v36 = vunpack.c.l.b16 %v1792_v18  ;;  %2516 = vmatpush3.bf16.msra.mxu0 %v2691_v19  ;;  %v1929_v24 = vrot.slane %v2740_v22, %v1200_v47 }
 0x507   : > { %v1810_v37 = vunpack.c.l.b16 %v1790_v39 }
 0x508   : > { %v1824_v49 = vsel %vm1823_vm13, %v1822_v32, %v1821_v17  ;;  %v1831_v34 = vrot.slane %v1812_v36, 1  ;;  %v1993_v32 = vsub.s32 4, %v3685_v35 }
 0x509   : > { %v1825_v38 = vrot.slane %v1810_v37, 3 }
 0x50a   : > { %v1994_v39 = vrot.slane %v2740_v22, %v1993_v32 }
 0x50b   : > { %v1827_v54 = vsel %vm1826_vm14, %v1825_v38, %v1824_v49 }
 0x50c   : > { %v1830_v40 = vsel %vm1829_vm15, %v1828_v43, %v1827_v54 }
 0x50d   : > { %v1833_v42 = vsel %vm1832_vm2, %v1831_v34, %v1830_v40 }
 0x50e   : > { %v1834_v46 = vpack.c.b16 %v1833_v42, %v1833_v42 }
 0x510   : > { %2510 = vmatmul.mubr.msk.bf16.vlgmr.msra.gmra.mxu1 %vm712_vm0, %v1834_v46 }
 0x511   : > { %2525 = vmatprep.mubr.msk.bf16.mxu1 %vm3170_vm1, %v3169_v13 }
 0x5d0   : > { %v1884_v50 = vpop.f32.mrf.mxu1 }
 0x5d1   : > { %v1885_v62 = vadd.f32 %v1884_v50, %v1796_v9 }
 0x5d2   : > { %v2511_v51 = vpop.f32.mrf.mxu1 }
 0x5d3   : > { %v1890_v59 = vsel %vm712_vm0, %v1885_v62, 0.0 }
 0x5d4   : > { %1891 = vadd.xlane.f32.xlu0 %v1890_v59  ;;  %v1887_v30 = vpop.f32.mrf.mxu1 }
 0x5d6   : > { %v2512_v61 = vpop.f32.mrf.mxu1 }
 0x65d   : > { %v1892_v52 = vpop.xlane.xlu0 %1891 }
 0x65e   : > { %v1893_v53 = vmul.f32 0.03125, %v1892_v52 }
 0x660   : > { %v1894_v1 = vsub.f32 %v1885_v62, %v1893_v53 }
 0x662   : > { %v1895_v0 = vmul.f32 %v1894_v1, %v1894_v1 }
 0x664   : > { %v1896_v56 = vsel %vm712_vm0, %v1895_v0, 0.0 }
 0x665   : > { %1897 = vadd.xlane.f32.xlu1 %v1896_v56 }
 0x6ee   : > { %v1898_v57 = vpop.xlane.xlu1 %1897 }
 0x6ef   : > { %v1899_v58 = vmul.f32 0.03125, %v1898_v57 }
 0x6f1   : > { %v1900_v4 = vadd.f32 1e-05, %v1899_v58 }
 0x6f3   : > { %2734 = vrsqrt.f32 %v1900_v4 }
 0x700   : > { %v2735_v45 = vpop.eup %2734 }
 0x701   : > { %v1902_v41 = vmul.f32 %v2735_v45, %v1894_v1 }
 0x703   : > { %v1903_v63 = vmul.f32 %v1902_v41, %v3695_v55 }
 0x705   : > { %v1904_v48 = vadd.f32 %v1903_v63, %v3700_v60 }
 0x707   : > { %v3951_v2 = vadd.f32 %v1904_v48, %v3716_v20  ;;  %v2692_v20 = vld [vmem:[#allocation19 + $0x8] sm:$0xff]  }
 0x708   : > { %2522 = vmatpush3.bf16.msra.mxu1 %v2692_v20 }
 0x709   : > { %v1906_v3 = vsel %vm712_vm0, %v3951_v2, 0.0  ;;  %2523 = vmatprep.subr.bf16.mxu1 %v3169_v13 }
 0x70a   : > { %1907 = vadd.xlane.f32.xlu0 %v1906_v3 }
 0x70c   : > { %2524 = vmatpush3.bf16.msra.mxu1 %v2693_v25 }
 0x793   : > { %v1908_v5 = vpop.xlane.xlu0 %1907 }
 0x794   : > { %v1909_v8 = vmul.f32 0.03125, %v1908_v5 }
 0x796   : > { %v1910_v23 = vsub.f32 %v3951_v2, %v1909_v8 }
 0x798   : > { %v1911_v12 = vmul.f32 %v1910_v23, %v1910_v23 }
 0x79a   : > { %v1912_v15 = vsel %vm712_vm0, %v1911_v12, 0.0 }
 0x79b   : > { %1913 = vadd.xlane.f32.xlu1 %v1912_v15 }
 0x824   : > { %v1914_v10 = vpop.xlane.xlu1 %1913 }
 0x825   : > { %v1915_v7 = vmul.f32 0.03125, %v1914_v10 }
 0x827   : > { %v1916_v27 = vadd.f32 1e-05, %v1915_v7 }
 0x829   : > { %2736 = vrsqrt.f32 %v1916_v27 }
 0x836   : > { %v2737_v29 = vpop.eup %2736 }
 0x837   : > { %v1918_v21 = vmul.f32 %v2737_v29, %v1910_v23 }
 0x839   : > { %v1919_v11 = vmul.f32 %v1918_v21, %v3695_v55 }
 0x83b   : > { %v1920_v6 = vadd.f32 %v1919_v11, %v3700_v60 }
 0x83d   : > { %v1925_v14 = vpack.c.bf16 %v1920_v6, %v1920_v6 }
 0x83f   : > { %2518 = vmatmul.mubr.msk.bf16.vlgmr.msra.gmra.mxu0 %vm712_vm0, %v1925_v14 }
 0x8ff   : > { %v1979_v13 = vpop.f32.mrf.mxu0 }
 0x900   : > { %v1980_v28 = vadd.f32 %v1979_v13, %v1929_v24 }
 0x901   : > { %v2519_v26 = vpop.f32.mrf.mxu0 }
 0x902   : > { %v1985_v44 = vmax.f32 %v1980_v28, 0.0 }
 0x903   : > { %v1982_v17 = vpop.f32.mrf.mxu0 }
 0x904   : > { %v1990_v18 = vpack.c.bf16 %v1985_v44, %v1985_v44 }
 0x905   : > { %v2520_v31 = vpop.f32.mrf.mxu0 }
 0x906   : > { %2526 = vmatmul.mubr.msk.bf16.vlgmr.msra.gmra.mxu1 %vm712_vm0, %v1990_v18 }
 0x9c6   : > { %v2044_v33 = vpop.f32.mrf.mxu1 }
 0x9c7   : > { %v2045_v49 = vadd.f32 %v2044_v33, %v1994_v39 }
 0x9c8   : > { %v2527_v36 = vpop.f32.mrf.mxu1 }
 0x9c9   : > { %v2050_v37 = vsel %vm712_vm0, %v2045_v49, 0.0 }
 0x9ca   : > { %2051 = vadd.xlane.f32.xlu0 %v2050_v37  ;;  %v2047_v38 = vpop.f32.mrf.mxu1 }
 0x9cc   : > { %v2528_v47 = vpop.f32.mrf.mxu1 }
 0xa53   : > { %v2052_v43 = vpop.xlane.xlu0 %2051 }
 0xa54   : > { %v2053_v34 = vmul.f32 0.03125, %v2052_v43 }
 0xa56   : > { %v2054_v54 = vsub.f32 %v2045_v49, %v2053_v34 }
 0xa58   : > { %v2055_v40 = vmul.f32 %v2054_v54, %v2054_v54 }
 0xa5a   : > { %v2056_v42 = vsel %vm712_vm0, %v2055_v40, 0.0 }
 0xa5b   : > { %2057 = vadd.xlane.f32.xlu1 %v2056_v42 }
 0xae4   : > { %v2058_v46 = vpop.xlane.xlu1 %2057 }
 0xae5   : > { %v2059_v35 = vmul.f32 0.03125, %v2058_v46 }
 0xae7   : > { %v2060_v9 = vadd.f32 1e-05, %v2059_v35 }
 0xae9   : > { %2738 = vrsqrt.f32 %v2060_v9 }
 0xaf6   : > { %v2739_v50 = vpop.eup %2738 }
 0xaf7   : > { %v2062_v62 = vmul.f32 %v2739_v50, %v2054_v54 }
 0xaf9   : > { %v2063_v51 = vmul.f32 %v2062_v62, %v3695_v55 }
 0xafb   : > { %v2064_v59 = vadd.f32 %v2063_v51, %v3700_v60 }
 0xafd   : > { %v2065_v30 = vadd.f32 %v2064_v59, %v3951_v2 }
 0xaff   : > { %v2066_v61 = vsel %vm712_vm0, %v2065_v30, 0.0 }
 0xb00   : > { %2067 = vst [vmem:[%s707_s28] sm:$0xff] %v2066_v61 }
 0xb01   : > { %3074 = shalt.err (!%p3071_p7)
}
 0xb02   : > { %s3075_s18 = scalar_lea.hbm %s3976_s10, 128  ;;  %s3079_s17 = scalar_lea.hbm %s4117_s4, 256 }
 0xb03   : > { %p3076_p2 = scmp.ne.s32.totalorder %s3976_s10, %s3075_s18  ;;  %p3080_p10 = scmp.lt.s32.totalorder %s3976_s10, %s4117_s4 }
 0xb04   : > { %p3081_p1 = scmp.lt.s32.totalorder %s3079_s17, %s3075_s18 }
 0xb05   : > { %p3077_p8 = pnand %p3076_p2, %p4118_p0 }
 0xb06   : > { %p3082_p5 = por %p3081_p1, %p3080_p10 }
 0xb07   : > { %p3078_p4 = pneg %p3077_p8 }
 0xb09   : > { %p3083_p13 = pnand %p3082_p5, %p3078_p4 }
 0xb0b   : > { %3086 = shalt.err (!%p3083_p13)
}
 0xb0c   : > { %2570 = dma.vmem_to_hbm [thread:$0]  (%p4118_p0), %s2083_s1, 128, %s3976_s10, %s2069_s19  }
 0xb0d PF: > { %s4119_s15 = sld [smem:[#allocation32_spill]]  ;;  %p4122_p9 = scmp.ge.s32.totalorder %s3153_s16, 2 }
 0xb0e   : > { %s4120_s7 = sld [smem:[#allocation40_spill]] }
 0xb13   : > { %s2094_s24 = sand.u32 1, %s4119_s15  }
 0xb14   : > { %p4121_p12 = scmp.ne.s32.totalorder %s4120_s7, 0  ;;  %s2095_s22 = scalar_lea.sflag [#allocation4], %s2094_s24 }
 0xb16   : > { %p2611_p11 = pnand %p4122_p9, %p4121_p12 }
 0xb18   : > { %p2612_p3 = pneg %p2611_p11 }
 0xb1a   : > { %3136 = dma.done.wait (%p2612_p3), %s2095_s22, 128  }
 0xb1b   : > { %3138 = vsyncadd (%p2612_p3), %s2095_s22, 4294967168  ;;  %s4123_s16 = sld [smem:[#allocation36_spill]] }
 0xb1c   : > { %s4124_s29 = sld [smem:[#allocation33_spill]] }
 0xb1d   : > { %s4125_s30 = sld [smem:[#allocation34_spill]] }
 0xb1e   : > { %s4126_s15 = sld [smem:[#allocation37_spill]] }
 0xb21   : > { %p37_p6 = scmp.ge.s32.totalorder %s4123_s16, 4  }
 0xb23   :  { %39 = sbr.rel (!%p37_p6) target bundleno = 22 (0x16), region = 190 }
 0xb28   :  { %2100 = vsyncpa [#allocation3], 1 }
 0xb29   :  { %2102 = vsyncpa [#allocation3 + $0x1], 1 }
 0xb2a   :  { %2103 = vsyncpa [#allocation6], 1 }
 0xb2b   :  { %2105 = vsyncpa [#allocation6 + $0x1], 1 }
 0xb2c   :  { %2106 = vsyncpa [#allocation9], 1 }
 0xb2d   :  { %2108 = vsyncpa [#allocation9 + $0x1], 1 }
 0xb2e   :  { %2109 = vsyncpa [#allocation12], 1 }
 0xb2f   :  { %2110 = vsyncpa [#allocation15], 1 }
 0xb30   :  { %2111 = vsyncpa [#allocation18], 1 }
 0xb31   :  { %2112 = vsyncpa [#allocation21], 1 }
 0xb32   :  { %2113 = vsyncpa [#allocation4], 1 }
 0xb33   :  { %2115 = vsyncpa [#allocation4 + $0x1], 1 }

</bundles_post_ra>
